<compile_context>
chip_gen: v7x
topology: tpu7x:2x2x1
jax: 0.10.0
libtpu: 0.0.40
codegen_flags: <defaults>
</compile_context>

<pallas_src>
import functools
import math

import jax
import jax.numpy as jnp
from jax.experimental import pallas as pl
from jax.experimental.pallas import tpu as pltpu


def _flash_attn_kernel(q_ref, k_ref, v_ref, o_ref,
                       qs_ref, m_ref, l_ref, acc_ref,
                       *, scale, num_heads, e_dim, d_dim):
    # q_ref: (1, tq, H*E)  k_ref: (1, tk, H*E)  v_ref: (1, tk, H*D)  o_ref: (1, tq, H*D)
    # qs_ref: (tq, H*E) bf16   m_ref / l_ref: (H, tq, 1) f32   acc_ref: (H, tq, D) f32
    kv = pl.program_id(2)

    @pl.when(kv == 0)
    def _():
        m_ref[...] = jnp.full(m_ref.shape, -jnp.inf, m_ref.dtype)
        l_ref[...] = jnp.zeros(l_ref.shape, l_ref.dtype)
        acc_ref[...] = jnp.zeros(acc_ref.shape, acc_ref.dtype)
        # Scale + cast Q once per (batch, q-tile); the Q block is resident across kv.
        qs_ref[...] = (q_ref[0] * scale).astype(qs_ref.dtype)

    qb = qs_ref[...]                                 # (tq, H*E) bf16, pre-scaled
    kb = k_ref[0].astype(jnp.bfloat16)               # (tk, H*E) bf16
    vb = v_ref[0].astype(jnp.bfloat16)               # (tk, H*D) bf16

    for h in range(num_heads):                       # static unroll; H is small
        q_h = qb[:, h * e_dim:(h + 1) * e_dim]       # (tq, E)
        k_h = kb[:, h * e_dim:(h + 1) * e_dim]       # (tk, E)
        v_h = vb[:, h * d_dim:(h + 1) * d_dim]       # (tk, D)

        # s = (q * scale) @ k^T, contracting the per-head E axis, f32 accumulation.
        s = jax.lax.dot_general(
            q_h, k_h,
            dimension_numbers=(((1,), (1,)), ((), ())),
            preferred_element_type=jnp.float32)      # (tq, tk) f32

        m_prev = m_ref[h]                            # (tq, 1)
        m_new = jnp.maximum(m_prev, s.max(axis=-1, keepdims=True))
        alpha = jnp.exp(m_prev - m_new)              # (tq, 1)
        p = jnp.exp(s - m_new)                       # (tq, tk) f32

        l_ref[h] = alpha * l_ref[h] + p.sum(axis=-1, keepdims=True)
        acc_ref[h] = alpha * acc_ref[h] + jnp.dot(
            p.astype(jnp.bfloat16), v_h, preferred_element_type=jnp.float32)
        m_ref[h] = m_new

    @pl.when(kv == pl.num_programs(2) - 1)
    def _():
        # Exact normalization; assemble all heads into one lane-dense store.
        outs = [acc_ref[h] / l_ref[h] for h in range(num_heads)]
        o_ref[0] = jnp.concatenate(outs, axis=-1).astype(o_ref.dtype)


def _tile(dim, target):
    """Largest multiple of 8 that divides `dim` and is <= target (else the full dim)."""
    if dim <= target:
        return dim
    t = (min(target, dim) // 8) * 8
    while t >= 8:
        if dim % t == 0:
            return t
        t -= 8
    return dim


def _vmem_bytes(tq, tk, H, E, D, itemsize):
    """Rough VMEM footprint: double-buffered blocks + persistent scratch."""
    he, hd = H * E, H * D
    blocks = 2 * (tq * he + tk * he + tk * hd + tq * hd) * itemsize
    d_pad = ((D + 127) // 128) * 128
    scratch = (tq * he * 2               # qs (bf16)
               + 2 * H * tq * 128 * 4    # m, l (lane-padded to 128)
               + H * tq * d_pad * 4)     # acc (lane-padded)
    return blocks + scratch


def full_attention(queries, keys, values, attn_mask=None, scale=None, *,
                   block_q=512, block_k=512):
    """queries [B,L,H,E], keys [B,S,H,E], values [B,S,H,D] -> [B,L,H,D].

    attn_mask is accepted for API parity but ignored (the reference module never uses it).
    """
    del attn_mask
    B, L, H, E = queries.shape
    _, S, _, D = values.shape
    if scale is None:
        scale = 1.0 / math.sqrt(E)

    # Free, layout-preserving reshapes (merge contiguous trailing dims): no HBM traffic.
    qf = queries.reshape(B, L, H * E)
    kf = keys.reshape(B, S, H * E)
    vf = values.reshape(B, S, H * D)

    tq = _tile(L, block_q)
    tk = _tile(S, block_k)

    # Keep double-buffered blocks + scratch within a conservative cross-chip budget.
    _VMEM_BUDGET = 20 * 1024 * 1024
    itemsize = jnp.dtype(queries.dtype).itemsize
    while _vmem_bytes(tq, tk, H, E, D, itemsize) > _VMEM_BUDGET:
        if tk >= tq and tk > 8:
            new_tk = _tile(S, tk // 2)
            if new_tk < tk:
                tk = new_tk
                continue
        if tq > 8:
            new_tq = _tile(L, tq // 2)
            if new_tq < tq:
                tq = new_tq
                continue
        break  # cannot shrink further (indivisible dims); rely on vmem_limit_bytes

    kernel = functools.partial(_flash_attn_kernel, scale=float(scale),
                               num_heads=H, e_dim=E, d_dim=D)

    out = pl.pallas_call(
        kernel,
        out_shape=jax.ShapeDtypeStruct((B, L, H * D), queries.dtype),
        grid_spec=pltpu.PrefetchScalarGridSpec(
            num_scalar_prefetch=0,
            grid=(B, L // tq, S // tk),              # kv reduction axis last
            in_specs=[
                pl.BlockSpec((1, tq, H * E), lambda b, i, j: (b, i, 0)),
                pl.BlockSpec((1, tk, H * E), lambda b, i, j: (b, j, 0)),
                pl.BlockSpec((1, tk, H * D), lambda b, i, j: (b, j, 0)),
            ],
            out_specs=pl.BlockSpec((1, tq, H * D), lambda b, i, j: (b, i, 0)),
            scratch_shapes=[
                pltpu.VMEM((tq, H * E), jnp.bfloat16),   # pre-scaled bf16 Q
                pltpu.VMEM((H, tq, 1), jnp.float32),     # running max m (per head)
                pltpu.VMEM((H, tq, 1), jnp.float32),     # running denom l (per head)
                pltpu.VMEM((H, tq, D), jnp.float32),     # f32 accumulator (per head)
            ],
        ),
        compiler_params=pltpu.CompilerParams(
            dimension_semantics=("parallel", "parallel", "arbitrary"),
            vmem_limit_bytes=32 * 1024 * 1024,
        ),
    )(qf, kf, vf)

    return out.reshape(B, L, H, D)


if __name__ == "__main__":
    # Small shapes consistent with the module: B=2, L=S=16, H=4, E=D=32.
    B, L, S, H, E, D = 2, 16, 16, 4, 32, 32

    key = jax.random.PRNGKey(0)
    kq, kk, kv_ = jax.random.split(key, 3)
    q = jax.random.normal(kq, (B, L, H, E), dtype=jnp.float32)
    k = jax.random.normal(kk, (B, S, H, E), dtype=jnp.float32)
    v = jax.random.normal(kv_, (B, S, H, D), dtype=jnp.float32)

    out = full_attention(q, k, v, attn_mask=None)
    out = jax.block_until_ready(out)

    # Pure-JAX reference of the PyTorch forward (inference: dropout = identity).
    scale = 1.0 / math.sqrt(E)
    scores = jnp.einsum("blhe,bshe->bhls", q, k)
    A = jax.nn.softmax(scores * scale, axis=-1)
    ref = jnp.einsum("bhls,bshd->blhd", A, v)

    assert out.shape == (B, L, H, D)
    max_err = float(jnp.max(jnp.abs(out - ref)))
    # bf16 MXU operands with f32 accumulation -> bf16-level tolerance vs f32 reference.
    assert jnp.allclose(out, ref, atol=3e-2, rtol=3e-2), max_err

    print("KERNEL_OK")
</pallas_src>

<mosaic_0001>
module attributes {stable_mosaic.version = 11 : i64} {
  func.func @_flash_attn_kernel(%arg0: i32, %arg1: i32, %arg2: i32, %arg3: memref<1x16x128xf32, #tpu.memory_space<vmem>>, %arg4: memref<1x16x128xf32, #tpu.memory_space<vmem>>, %arg5: memref<1x16x128xf32, #tpu.memory_space<vmem>>, %arg6: memref<1x16x128xf32, #tpu.memory_space<vmem>>, %arg7: memref<16x128xbf16, #tpu.memory_space<vmem>>, %arg8: memref<4x16x1xf32, #tpu.memory_space<vmem>>, %arg9: memref<4x16x1xf32, #tpu.memory_space<vmem>>, %arg10: memref<4x16x32xf32, #tpu.memory_space<vmem>>) attributes {dimension_semantics = [#tpu.dimension_semantics<parallel>, #tpu.dimension_semantics<parallel>, #tpu.dimension_semantics<arbitrary>], iteration_bounds = array<i64: 2, 1, 1>, scalar_prefetch = 0 : i64, scratch_operands = 4 : i64, tpu.core_type = #tpu.core_type<tc>, window_params = [{transform_indices = @transform_0, window_bounds = array<i64: 1, 16, 128>}, {transform_indices = @transform_1, window_bounds = array<i64: 1, 16, 128>}, {transform_indices = @transform_2, window_bounds = array<i64: 1, 16, 128>}, {transform_indices = @transform_3, window_bounds = array<i64: 1, 16, 128>}]} {
    %c0_i32 = arith.constant 0 : i32
    %0 = arith.cmpi eq, %arg2, %c0_i32 : i32
    %1 = arith.extui %0 : i1 to i32
    %c0_i32_0 = arith.constant 0 : i32
    %2 = arith.cmpi ne, %1, %c0_i32_0 : i32
    scf.if %2 {
      %cst_94 = arith.constant 0xFF800000 : f32
      %157 = vector.broadcast %cst_94 : f32 to vector<4x16x1xf32>
      %c0_95 = arith.constant 0 : index
      %c0_96 = arith.constant 0 : index
      %c0_97 = arith.constant 0 : index
      %158 = vector.load %arg8[%c0_95, %c0_96, %c0_97] : memref<4x16x1xf32, #tpu.memory_space<vmem>>, vector<4x16x1xf32>
      tpu.vector_store %arg8[%c0_95, %c0_96, %c0_97], %157 {strides = array<i32>} : memref<4x16x1xf32, #tpu.memory_space<vmem>>, vector<4x16x1xf32>,
      %cst_98 = arith.constant 0.000000e+00 : f32
      %159 = vector.broadcast %cst_98 : f32 to vector<4x16x1xf32>
      %c0_99 = arith.constant 0 : index
      %c0_100 = arith.constant 0 : index
      %c0_101 = arith.constant 0 : index
      %160 = vector.load %arg9[%c0_99, %c0_100, %c0_101] : memref<4x16x1xf32, #tpu.memory_space<vmem>>, vector<4x16x1xf32>
      tpu.vector_store %arg9[%c0_99, %c0_100, %c0_101], %159 {strides = array<i32>} : memref<4x16x1xf32, #tpu.memory_space<vmem>>, vector<4x16x1xf32>,
      %cst_102 = arith.constant 0.000000e+00 : f32
      %161 = vector.broadcast %cst_102 : f32 to vector<4x16x32xf32>
      %c0_103 = arith.constant 0 : index
      %c0_104 = arith.constant 0 : index
      %c0_105 = arith.constant 0 : index
      %162 = vector.load %arg10[%c0_103, %c0_104, %c0_105] : memref<4x16x32xf32, #tpu.memory_space<vmem>>, vector<4x16x32xf32>
      tpu.vector_store %arg10[%c0_103, %c0_104, %c0_105], %161 {strides = array<i32>} : memref<4x16x32xf32, #tpu.memory_space<vmem>>, vector<4x16x32xf32>,
      %c0_106 = arith.constant 0 : index
      %c0_107 = arith.constant 0 : index
      %c0_108 = arith.constant 0 : index
      %163 = vector.load %arg3[%c0_106, %c0_107, %c0_108] : memref<1x16x128xf32, #tpu.memory_space<vmem>>, vector<1x16x128xf32>
      %164 = vector.shape_cast %163 : vector<1x16x128xf32> to vector<16x128xf32>
      %cst_109 = arith.constant 0.176776692 : f32
      %165 = vector.broadcast %cst_109 : f32 to vector<16x128xf32>
      %166 = arith.mulf %164, %165 : vector<16x128xf32>
      %167 = arith.truncf %166 : vector<16x128xf32> to vector<16x128xbf16>
      %c0_110 = arith.constant 0 : index
      %c0_111 = arith.constant 0 : index
      %168 = vector.load %arg7[%c0_110, %c0_111] : memref<16x128xbf16, #tpu.memory_space<vmem>>, vector<16x128xbf16>
      tpu.vector_store %arg7[%c0_110, %c0_111], %167 {strides = array<i32>} : memref<16x128xbf16, #tpu.memory_space<vmem>>, vector<16x128xbf16>,
    } else {
    }
    %c0 = arith.constant 0 : index
    %c0_1 = arith.constant 0 : index
    %3 = vector.load %arg7[%c0, %c0_1] : memref<16x128xbf16, #tpu.memory_space<vmem>>, vector<16x128xbf16>
    %c0_2 = arith.constant 0 : index
    %c0_3 = arith.constant 0 : index
    %c0_4 = arith.constant 0 : index
    %4 = vector.load %arg4[%c0_2, %c0_3, %c0_4] : memref<1x16x128xf32, #tpu.memory_space<vmem>>, vector<1x16x128xf32>
    %5 = vector.shape_cast %4 : vector<1x16x128xf32> to vector<16x128xf32>
    %6 = arith.truncf %5 : vector<16x128xf32> to vector<16x128xbf16>
    %c0_5 = arith.constant 0 : index
    %c0_6 = arith.constant 0 : index
    %c0_7 = arith.constant 0 : index
    %7 = vector.load %arg5[%c0_5, %c0_6, %c0_7] : memref<1x16x128xf32, #tpu.memory_space<vmem>>, vector<1x16x128xf32>
    %8 = vector.shape_cast %7 : vector<1x16x128xf32> to vector<16x128xf32>
    %9 = arith.truncf %8 : vector<16x128xf32> to vector<16x128xbf16>
    %10 = vector.extract_strided_slice %3 {offsets = [0, 0], sizes = [16, 32], strides = [1, 1]} : vector<16x128xbf16> to vector<16x32xbf16>
    %11 = vector.extract_strided_slice %6 {offsets = [0, 0], sizes = [16, 32], strides = [1, 1]} : vector<16x128xbf16> to vector<16x32xbf16>
    %12 = vector.extract_strided_slice %9 {offsets = [0, 0], sizes = [16, 32], strides = [1, 1]} : vector<16x128xbf16> to vector<16x32xbf16>
    %cst = arith.constant dense<0.000000e+00> : vector<16x16xf32>
    %13 = tpu.matmul %10, %11, %cst {dimension_numbers = #tpu.dot_dimension_numbers<[1], [1], [0], [0], [0, 0, 1, 0], [], []>} : vector<16x32xbf16>, vector<16x32xbf16>, vector<16x16xf32> -> vector<16x16xf32>
    %c0_8 = arith.constant 0 : index
    %c0_9 = arith.constant 0 : index
    %c0_10 = arith.constant 0 : index
    %14 = vector.load %arg8[%c0_8, %c0_9, %c0_10] : memref<4x16x1xf32, #tpu.memory_space<vmem>>, vector<1x16x1xf32>
    %15 = vector.shape_cast %14 : vector<1x16x1xf32> to vector<16x1xf32>
    %cst_11 = arith.constant dense<0xFF800000> : vector<16xf32>
    %16 = vector.multi_reduction <maximumf>, %13, %cst_11 [1] : vector<16x16xf32> to vector<16xf32>
    %17 = vector.shape_cast %16 : vector<16xf32> to vector<16x1xf32>
    %18 = arith.maximumf %15, %17 : vector<16x1xf32>
    %19 = arith.subf %15, %18 : vector<16x1xf32>
    %20 = math.exp %19 : vector<16x1xf32>
    %21 = vector.broadcast %18 : vector<16x1xf32> to vector<16x16xf32>
    %22 = arith.subf %13, %21 : vector<16x16xf32>
    %23 = math.exp %22 : vector<16x16xf32>
    %c0_12 = arith.constant 0 : index
    %c0_13 = arith.constant 0 : index
    %c0_14 = arith.constant 0 : index
    %24 = vector.load %arg9[%c0_12, %c0_13, %c0_14] : memref<4x16x1xf32, #tpu.memory_space<vmem>>, vector<1x16x1xf32>
    %25 = vector.shape_cast %24 : vector<1x16x1xf32> to vector<16x1xf32>
    %26 = arith.mulf %20, %25 : vector<16x1xf32>
    %cst_15 = arith.constant dense<0.000000e+00> : vector<16xf32>
    %27 = vector.multi_reduction <add>, %23, %cst_15 [1] : vector<16x16xf32> to vector<16xf32>
    %28 = vector.shape_cast %27 : vector<16xf32> to vector<16x1xf32>
    %29 = arith.addf %26, %28 : vector<16x1xf32>
    %c0_16 = arith.constant 0 : index
    %c0_17 = arith.constant 0 : index
    %c0_18 = arith.constant 0 : index
    %30 = vector.load %arg9[%c0_16, %c0_17, %c0_18] : memref<4x16x1xf32, #tpu.memory_space<vmem>>, vector<1x16x1xf32>
    %31 = vector.shape_cast %30 : vector<1x16x1xf32> to vector<16x1xf32>
    %32 = vector.shape_cast %29 : vector<16x1xf32> to vector<1x16x1xf32>
    tpu.vector_store %arg9[%c0_16, %c0_17, %c0_18], %32 {strides = array<i32>} : memref<4x16x1xf32, #tpu.memory_space<vmem>>, vector<1x16x1xf32>,
    %c0_19 = arith.constant 0 : index
    %c0_20 = arith.constant 0 : index
    %c0_21 = arith.constant 0 : index
    %33 = vector.load %arg10[%c0_19, %c0_20, %c0_21] : memref<4x16x32xf32, #tpu.memory_space<vmem>>, vector<1x16x32xf32>
    %34 = vector.shape_cast %33 : vector<1x16x32xf32> to vector<16x32xf32>
    %35 = vector.broadcast %20 : vector<16x1xf32> to vector<16x32xf32>
    %36 = arith.mulf %35, %34 : vector<16x32xf32>
    %37 = arith.truncf %23 : vector<16x16xf32> to vector<16x16xbf16>
    %cst_22 = arith.constant dense<0.000000e+00> : vector<16x32xf32>
    %38 = tpu.matmul %37, %12, %cst_22 {dimension_numbers = #tpu.dot_dimension_numbers<[1], [0], [0], [1], [0, 0, 1, 1], [], []>} : vector<16x16xbf16>, vector<16x32xbf16>, vector<16x32xf32> -> vector<16x32xf32>
    %39 = arith.addf %36, %38 : vector<16x32xf32>
    %c0_23 = arith.constant 0 : index
    %c0_24 = arith.constant 0 : index
    %c0_25 = arith.constant 0 : index
    %40 = vector.load %arg10[%c0_23, %c0_24, %c0_25] : memref<4x16x32xf32, #tpu.memory_space<vmem>>, vector<1x16x32xf32>
    %41 = vector.shape_cast %40 : vector<1x16x32xf32> to vector<16x32xf32>
    %42 = vector.shape_cast %39 : vector<16x32xf32> to vector<1x16x32xf32>
    tpu.vector_store %arg10[%c0_23, %c0_24, %c0_25], %42 {strides = array<i32>} : memref<4x16x32xf32, #tpu.memory_space<vmem>>, vector<1x16x32xf32>,
    %c0_26 = arith.constant 0 : index
    %c0_27 = arith.constant 0 : index
    %c0_28 = arith.constant 0 : index
    %43 = vector.load %arg8[%c0_26, %c0_27, %c0_28] : memref<4x16x1xf32, #tpu.memory_space<vmem>>, vector<1x16x1xf32>
    %44 = vector.shape_cast %43 : vector<1x16x1xf32> to vector<16x1xf32>
    %45 = vector.shape_cast %18 : vector<16x1xf32> to vector<1x16x1xf32>
    tpu.vector_store %arg8[%c0_26, %c0_27, %c0_28], %45 {strides = array<i32>} : memref<4x16x1xf32, #tpu.memory_space<vmem>>, vector<1x16x1xf32>,
    %46 = vector.extract_strided_slice %3 {offsets = [0, 32], sizes = [16, 32], strides = [1, 1]} : vector<16x128xbf16> to vector<16x32xbf16>
    %47 = vector.extract_strided_slice %6 {offsets = [0, 32], sizes = [16, 32], strides = [1, 1]} : vector<16x128xbf16> to vector<16x32xbf16>
    %48 = vector.extract_strided_slice %9 {offsets = [0, 32], sizes = [16, 32], strides = [1, 1]} : vector<16x128xbf16> to vector<16x32xbf16>
    %cst_29 = arith.constant dense<0.000000e+00> : vector<16x16xf32>
    %49 = tpu.matmul %46, %47, %cst_29 {dimension_numbers = #tpu.dot_dimension_numbers<[1], [1], [0], [0], [0, 0, 1, 0], [], []>} : vector<16x32xbf16>, vector<16x32xbf16>, vector<16x16xf32> -> vector<16x16xf32>
    %c1 = arith.constant 1 : index
    %c0_30 = arith.constant 0 : index
    %c0_31 = arith.constant 0 : index
    %50 = vector.load %arg8[%c1, %c0_30, %c0_31] : memref<4x16x1xf32, #tpu.memory_space<vmem>>, vector<1x16x1xf32>
    %51 = vector.shape_cast %50 : vector<1x16x1xf32> to vector<16x1xf32>
    %cst_32 = arith.constant dense<0xFF800000> : vector<16xf32>
    %52 = vector.multi_reduction <maximumf>, %49, %cst_32 [1] : vector<16x16xf32> to vector<16xf32>
    %53 = vector.shape_cast %52 : vector<16xf32> to vector<16x1xf32>
    %54 = arith.maximumf %51, %53 : vector<16x1xf32>
    %55 = arith.subf %51, %54 : vector<16x1xf32>
    %56 = math.exp %55 : vector<16x1xf32>
    %57 = vector.broadcast %54 : vector<16x1xf32> to vector<16x16xf32>
    %58 = arith.subf %49, %57 : vector<16x16xf32>
    %59 = math.exp %58 : vector<16x16xf32>
    %c1_33 = arith.constant 1 : index
    %c0_34 = arith.constant 0 : index
    %c0_35 = arith.constant 0 : index
    %60 = vector.load %arg9[%c1_33, %c0_34, %c0_35] : memref<4x16x1xf32, #tpu.memory_space<vmem>>, vector<1x16x1xf32>
    %61 = vector.shape_cast %60 : vector<1x16x1xf32> to vector<16x1xf32>
    %62 = arith.mulf %56, %61 : vector<16x1xf32>
    %cst_36 = arith.constant dense<0.000000e+00> : vector<16xf32>
    %63 = vector.multi_reduction <add>, %59, %cst_36 [1] : vector<16x16xf32> to vector<16xf32>
    %64 = vector.shape_cast %63 : vector<16xf32> to vector<16x1xf32>
    %65 = arith.addf %62, %64 : vector<16x1xf32>
    %c1_37 = arith.constant 1 : index
    %c0_38 = arith.constant 0 : index
    %c0_39 = arith.constant 0 : index
    %66 = vector.load %arg9[%c1_37, %c0_38, %c0_39] : memref<4x16x1xf32, #tpu.memory_space<vmem>>, vector<1x16x1xf32>
    %67 = vector.shape_cast %66 : vector<1x16x1xf32> to vector<16x1xf32>
    %68 = vector.shape_cast %65 : vector<16x1xf32> to vector<1x16x1xf32>
    tpu.vector_store %arg9[%c1_37, %c0_38, %c0_39], %68 {strides = array<i32>} : memref<4x16x1xf32, #tpu.memory_space<vmem>>, vector<1x16x1xf32>,
    %c1_40 = arith.constant 1 : index
    %c0_41 = arith.constant 0 : index
    %c0_42 = arith.constant 0 : index
    %69 = vector.load %arg10[%c1_40, %c0_41, %c0_42] : memref<4x16x32xf32, #tpu.memory_space<vmem>>, vector<1x16x32xf32>
    %70 = vector.shape_cast %69 : vector<1x16x32xf32> to vector<16x32xf32>
    %71 = vector.broadcast %56 : vector<16x1xf32> to vector<16x32xf32>
    %72 = arith.mulf %71, %70 : vector<16x32xf32>
    %73 = arith.truncf %59 : vector<16x16xf32> to vector<16x16xbf16>
    %cst_43 = arith.constant dense<0.000000e+00> : vector<16x32xf32>
    %74 = tpu.matmul %73, %48, %cst_43 {dimension_numbers = #tpu.dot_dimension_numbers<[1], [0], [0], [1], [0, 0, 1, 1], [], []>} : vector<16x16xbf16>, vector<16x32xbf16>, vector<16x32xf32> -> vector<16x32xf32>
    %75 = arith.addf %72, %74 : vector<16x32xf32>
    %c1_44 = arith.constant 1 : index
    %c0_45 = arith.constant 0 : index
    %c0_46 = arith.constant 0 : index
    %76 = vector.load %arg10[%c1_44, %c0_45, %c0_46] : memref<4x16x32xf32, #tpu.memory_space<vmem>>, vector<1x16x32xf32>
    %77 = vector.shape_cast %76 : vector<1x16x32xf32> to vector<16x32xf32>
    %78 = vector.shape_cast %75 : vector<16x32xf32> to vector<1x16x32xf32>
    tpu.vector_store %arg10[%c1_44, %c0_45, %c0_46], %78 {strides = array<i32>} : memref<4x16x32xf32, #tpu.memory_space<vmem>>, vector<1x16x32xf32>,
    %c1_47 = arith.constant 1 : index
    %c0_48 = arith.constant 0 : index
    %c0_49 = arith.constant 0 : index
    %79 = vector.load %arg8[%c1_47, %c0_48, %c0_49] : memref<4x16x1xf32, #tpu.memory_space<vmem>>, vector<1x16x1xf32>
    %80 = vector.shape_cast %79 : vector<1x16x1xf32> to vector<16x1xf32>
    %81 = vector.shape_cast %54 : vector<16x1xf32> to vector<1x16x1xf32>
    tpu.vector_store %arg8[%c1_47, %c0_48, %c0_49], %81 {strides = array<i32>} : memref<4x16x1xf32, #tpu.memory_space<vmem>>, vector<1x16x1xf32>,
    %82 = vector.extract_strided_slice %3 {offsets = [0, 64], sizes = [16, 32], strides = [1, 1]} : vector<16x128xbf16> to vector<16x32xbf16>
    %83 = vector.extract_strided_slice %6 {offsets = [0, 64], sizes = [16, 32], strides = [1, 1]} : vector<16x128xbf16> to vector<16x32xbf16>
    %84 = vector.extract_strided_slice %9 {offsets = [0, 64], sizes = [16, 32], strides = [1, 1]} : vector<16x128xbf16> to vector<16x32xbf16>
    %cst_50 = arith.constant dense<0.000000e+00> : vector<16x16xf32>
    %85 = tpu.matmul %82, %83, %cst_50 {dimension_numbers = #tpu.dot_dimension_numbers<[1], [1], [0], [0], [0, 0, 1, 0], [], []>} : vector<16x32xbf16>, vector<16x32xbf16>, vector<16x16xf32> -> vector<16x16xf32>
    %c2 = arith.constant 2 : index
    %c0_51 = arith.constant 0 : index
    %c0_52 = arith.constant 0 : index
    %86 = vector.load %arg8[%c2, %c0_51, %c0_52] : memref<4x16x1xf32, #tpu.memory_space<vmem>>, vector<1x16x1xf32>
    %87 = vector.shape_cast %86 : vector<1x16x1xf32> to vector<16x1xf32>
    %cst_53 = arith.constant dense<0xFF800000> : vector<16xf32>
    %88 = vector.multi_reduction <maximumf>, %85, %cst_53 [1] : vector<16x16xf32> to vector<16xf32>
    %89 = vector.shape_cast %88 : vector<16xf32> to vector<16x1xf32>
    %90 = arith.maximumf %87, %89 : vector<16x1xf32>
    %91 = arith.subf %87, %90 : vector<16x1xf32>
    %92 = math.exp %91 : vector<16x1xf32>
    %93 = vector.broadcast %90 : vector<16x1xf32> to vector<16x16xf32>
    %94 = arith.subf %85, %93 : vector<16x16xf32>
    %95 = math.exp %94 : vector<16x16xf32>
    %c2_54 = arith.constant 2 : index
    %c0_55 = arith.constant 0 : index
    %c0_56 = arith.constant 0 : index
    %96 = vector.load %arg9[%c2_54, %c0_55, %c0_56] : memref<4x16x1xf32, #tpu.memory_space<vmem>>, vector<1x16x1xf32>
    %97 = vector.shape_cast %96 : vector<1x16x1xf32> to vector<16x1xf32>
    %98 = arith.mulf %92, %97 : vector<16x1xf32>
    %cst_57 = arith.constant dense<0.000000e+00> : vector<16xf32>
    %99 = vector.multi_reduction <add>, %95, %cst_57 [1] : vector<16x16xf32> to vector<16xf32>
    %100 = vector.shape_cast %99 : vector<16xf32> to vector<16x1xf32>
    %101 = arith.addf %98, %100 : vector<16x1xf32>
    %c2_58 = arith.constant 2 : index
    %c0_59 = arith.constant 0 : index
    %c0_60 = arith.constant 0 : index
    %102 = vector.load %arg9[%c2_58, %c0_59, %c0_60] : memref<4x16x1xf32, #tpu.memory_space<vmem>>, vector<1x16x1xf32>
    %103 = vector.shape_cast %102 : vector<1x16x1xf32> to vector<16x1xf32>
    %104 = vector.shape_cast %101 : vector<16x1xf32> to vector<1x16x1xf32>
    tpu.vector_store %arg9[%c2_58, %c0_59, %c0_60], %104 {strides = array<i32>} : memref<4x16x1xf32, #tpu.memory_space<vmem>>, vector<1x16x1xf32>,
    %c2_61 = arith.constant 2 : index
    %c0_62 = arith.constant 0 : index
    %c0_63 = arith.constant 0 : index
    %105 = vector.load %arg10[%c2_61, %c0_62, %c0_63] : memref<4x16x32xf32, #tpu.memory_space<vmem>>, vector<1x16x32xf32>
    %106 = vector.shape_cast %105 : vector<1x16x32xf32> to vector<16x32xf32>
    %107 = vector.broadcast %92 : vector<16x1xf32> to vector<16x32xf32>
    %108 = arith.mulf %107, %106 : vector<16x32xf32>
    %109 = arith.truncf %95 : vector<16x16xf32> to vector<16x16xbf16>
    %cst_64 = arith.constant dense<0.000000e+00> : vector<16x32xf32>
    %110 = tpu.matmul %109, %84, %cst_64 {dimension_numbers = #tpu.dot_dimension_numbers<[1], [0], [0], [1], [0, 0, 1, 1], [], []>} : vector<16x16xbf16>, vector<16x32xbf16>, vector<16x32xf32> -> vector<16x32xf32>
    %111 = arith.addf %108, %110 : vector<16x32xf32>
    %c2_65 = arith.constant 2 : index
    %c0_66 = arith.constant 0 : index
    %c0_67 = arith.constant 0 : index
    %112 = vector.load %arg10[%c2_65, %c0_66, %c0_67] : memref<4x16x32xf32, #tpu.memory_space<vmem>>, vector<1x16x32xf32>
    %113 = vector.shape_cast %112 : vector<1x16x32xf32> to vector<16x32xf32>
    %114 = vector.shape_cast %111 : vector<16x32xf32> to vector<1x16x32xf32>
    tpu.vector_store %arg10[%c2_65, %c0_66, %c0_67], %114 {strides = array<i32>} : memref<4x16x32xf32, #tpu.memory_space<vmem>>, vector<1x16x32xf32>,
    %c2_68 = arith.constant 2 : index
    %c0_69 = arith.constant 0 : index
    %c0_70 = arith.constant 0 : index
    %115 = vector.load %arg8[%c2_68, %c0_69, %c0_70] : memref<4x16x1xf32, #tpu.memory_space<vmem>>, vector<1x16x1xf32>
    %116 = vector.shape_cast %115 : vector<1x16x1xf32> to vector<16x1xf32>
    %117 = vector.shape_cast %90 : vector<16x1xf32> to vector<1x16x1xf32>
    tpu.vector_store %arg8[%c2_68, %c0_69, %c0_70], %117 {strides = array<i32>} : memref<4x16x1xf32, #tpu.memory_space<vmem>>, vector<1x16x1xf32>,
    %118 = vector.extract_strided_slice %3 {offsets = [0, 96], sizes = [16, 32], strides = [1, 1]} : vector<16x128xbf16> to vector<16x32xbf16>
    %119 = vector.extract_strided_slice %6 {offsets = [0, 96], sizes = [16, 32], strides = [1, 1]} : vector<16x128xbf16> to vector<16x32xbf16>
    %120 = vector.extract_strided_slice %9 {offsets = [0, 96], sizes = [16, 32], strides = [1, 1]} : vector<16x128xbf16> to vector<16x32xbf16>
    %cst_71 = arith.constant dense<0.000000e+00> : vector<16x16xf32>
    %121 = tpu.matmul %118, %119, %cst_71 {dimension_numbers = #tpu.dot_dimension_numbers<[1], [1], [0], [0], [0, 0, 1, 0], [], []>} : vector<16x32xbf16>, vector<16x32xbf16>, vector<16x16xf32> -> vector<16x16xf32>
    %c3 = arith.constant 3 : index
    %c0_72 = arith.constant 0 : index
    %c0_73 = arith.constant 0 : index
    %122 = vector.load %arg8[%c3, %c0_72, %c0_73] : memref<4x16x1xf32, #tpu.memory_space<vmem>>, vector<1x16x1xf32>
    %123 = vector.shape_cast %122 : vector<1x16x1xf32> to vector<16x1xf32>
    %cst_74 = arith.constant dense<0xFF800000> : vector<16xf32>
    %124 = vector.multi_reduction <maximumf>, %121, %cst_74 [1] : vector<16x16xf32> to vector<16xf32>
    %125 = vector.shape_cast %124 : vector<16xf32> to vector<16x1xf32>
    %126 = arith.maximumf %123, %125 : vector<16x1xf32>
    %127 = arith.subf %123, %126 : vector<16x1xf32>
    %128 = math.exp %127 : vector<16x1xf32>
    %129 = vector.broadcast %126 : vector<16x1xf32> to vector<16x16xf32>
    %130 = arith.subf %121, %129 : vector<16x16xf32>
    %131 = math.exp %130 : vector<16x16xf32>
    %c3_75 = arith.constant 3 : index
    %c0_76 = arith.constant 0 : index
    %c0_77 = arith.constant 0 : index
    %132 = vector.load %arg9[%c3_75, %c0_76, %c0_77] : memref<4x16x1xf32, #tpu.memory_space<vmem>>, vector<1x16x1xf32>
    %133 = vector.shape_cast %132 : vector<1x16x1xf32> to vector<16x1xf32>
    %134 = arith.mulf %128, %133 : vector<16x1xf32>
    %cst_78 = arith.constant dense<0.000000e+00> : vector<16xf32>
    %135 = vector.multi_reduction <add>, %131, %cst_78 [1] : vector<16x16xf32> to vector<16xf32>
    %136 = vector.shape_cast %135 : vector<16xf32> to vector<16x1xf32>
    %137 = arith.addf %134, %136 : vector<16x1xf32>
    %c3_79 = arith.constant 3 : index
    %c0_80 = arith.constant 0 : index
    %c0_81 = arith.constant 0 : index
    %138 = vector.load %arg9[%c3_79, %c0_80, %c0_81] : memref<4x16x1xf32, #tpu.memory_space<vmem>>, vector<1x16x1xf32>
    %139 = vector.shape_cast %138 : vector<1x16x1xf32> to vector<16x1xf32>
    %140 = vector.shape_cast %137 : vector<16x1xf32> to vector<1x16x1xf32>
    tpu.vector_store %arg9[%c3_79, %c0_80, %c0_81], %140 {strides = array<i32>} : memref<4x16x1xf32, #tpu.memory_space<vmem>>, vector<1x16x1xf32>,
    %c3_82 = arith.constant 3 : index
    %c0_83 = arith.constant 0 : index
    %c0_84 = arith.constant 0 : index
    %141 = vector.load %arg10[%c3_82, %c0_83, %c0_84] : memref<4x16x32xf32, #tpu.memory_space<vmem>>, vector<1x16x32xf32>
    %142 = vector.shape_cast %141 : vector<1x16x32xf32> to vector<16x32xf32>
    %143 = vector.broadcast %128 : vector<16x1xf32> to vector<16x32xf32>
    %144 = arith.mulf %143, %142 : vector<16x32xf32>
    %145 = arith.truncf %131 : vector<16x16xf32> to vector<16x16xbf16>
    %cst_85 = arith.constant dense<0.000000e+00> : vector<16x32xf32>
    %146 = tpu.matmul %145, %120, %cst_85 {dimension_numbers = #tpu.dot_dimension_numbers<[1], [0], [0], [1], [0, 0, 1, 1], [], []>} : vector<16x16xbf16>, vector<16x32xbf16>, vector<16x32xf32> -> vector<16x32xf32>
    %147 = arith.addf %144, %146 : vector<16x32xf32>
    %c3_86 = arith.constant 3 : index
    %c0_87 = arith.constant 0 : index
    %c0_88 = arith.constant 0 : index
    %148 = vector.load %arg10[%c3_86, %c0_87, %c0_88] : memref<4x16x32xf32, #tpu.memory_space<vmem>>, vector<1x16x32xf32>
    %149 = vector.shape_cast %148 : vector<1x16x32xf32> to vector<16x32xf32>
    %150 = vector.shape_cast %147 : vector<16x32xf32> to vector<1x16x32xf32>
    tpu.vector_store %arg10[%c3_86, %c0_87, %c0_88], %150 {strides = array<i32>} : memref<4x16x32xf32, #tpu.memory_space<vmem>>, vector<1x16x32xf32>,
    %c3_89 = arith.constant 3 : index
    %c0_90 = arith.constant 0 : index
    %c0_91 = arith.constant 0 : index
    %151 = vector.load %arg8[%c3_89, %c0_90, %c0_91] : memref<4x16x1xf32, #tpu.memory_space<vmem>>, vector<1x16x1xf32>
    %152 = vector.shape_cast %151 : vector<1x16x1xf32> to vector<16x1xf32>
    %153 = vector.shape_cast %126 : vector<16x1xf32> to vector<1x16x1xf32>
    tpu.vector_store %arg8[%c3_89, %c0_90, %c0_91], %153 {strides = array<i32>} : memref<4x16x1xf32, #tpu.memory_space<vmem>>, vector<1x16x1xf32>,
    %c0_i32_92 = arith.constant 0 : i32
    %154 = arith.cmpi eq, %arg2, %c0_i32_92 : i32
    %155 = arith.extui %154 : i1 to i32
    %c0_i32_93 = arith.constant 0 : i32
    %156 = arith.cmpi ne, %155, %c0_i32_93 : i32
    scf.if %156 {
      %c0_94 = arith.constant 0 : index
      %c0_95 = arith.constant 0 : index
      %c0_96 = arith.constant 0 : index
      %157 = vector.load %arg10[%c0_94, %c0_95, %c0_96] : memref<4x16x32xf32, #tpu.memory_space<vmem>>, vector<1x16x32xf32>
      %158 = vector.shape_cast %157 : vector<1x16x32xf32> to vector<16x32xf32>
      %c0_97 = arith.constant 0 : index
      %c0_98 = arith.constant 0 : index
      %c0_99 = arith.constant 0 : index
      %159 = vector.load %arg9[%c0_97, %c0_98, %c0_99] : memref<4x16x1xf32, #tpu.memory_space<vmem>>, vector<1x16x1xf32>
      %160 = vector.shape_cast %159 : vector<1x16x1xf32> to vector<16x1xf32>
      %161 = vector.broadcast %160 : vector<16x1xf32> to vector<16x32xf32>
      %162 = arith.divf %158, %161 : vector<16x32xf32>
      %c1_100 = arith.constant 1 : index
      %c0_101 = arith.constant 0 : index
      %c0_102 = arith.constant 0 : index
      %163 = vector.load %arg10[%c1_100, %c0_101, %c0_102] : memref<4x16x32xf32, #tpu.memory_space<vmem>>, vector<1x16x32xf32>
      %164 = vector.shape_cast %163 : vector<1x16x32xf32> to vector<16x32xf32>
      %c1_103 = arith.constant 1 : index
      %c0_104 = arith.constant 0 : index
      %c0_105 = arith.constant 0 : index
      %165 = vector.load %arg9[%c1_103, %c0_104, %c0_105] : memref<4x16x1xf32, #tpu.memory_space<vmem>>, vector<1x16x1xf32>
      %166 = vector.shape_cast %165 : vector<1x16x1xf32> to vector<16x1xf32>
      %167 = vector.broadcast %166 : vector<16x1xf32> to vector<16x32xf32>
      %168 = arith.divf %164, %167 : vector<16x32xf32>
      %c2_106 = arith.constant 2 : index
      %c0_107 = arith.constant 0 : index
      %c0_108 = arith.constant 0 : index
      %169 = vector.load %arg10[%c2_106, %c0_107, %c0_108] : memref<4x16x32xf32, #tpu.memory_space<vmem>>, vector<1x16x32xf32>
      %170 = vector.shape_cast %169 : vector<1x16x32xf32> to vector<16x32xf32>
      %c2_109 = arith.constant 2 : index
      %c0_110 = arith.constant 0 : index
      %c0_111 = arith.constant 0 : index
      %171 = vector.load %arg9[%c2_109, %c0_110, %c0_111] : memref<4x16x1xf32, #tpu.memory_space<vmem>>, vector<1x16x1xf32>
      %172 = vector.shape_cast %171 : vector<1x16x1xf32> to vector<16x1xf32>
      %173 = vector.broadcast %172 : vector<16x1xf32> to vector<16x32xf32>
      %174 = arith.divf %170, %173 : vector<16x32xf32>
      %c3_112 = arith.constant 3 : index
      %c0_113 = arith.constant 0 : index
      %c0_114 = arith.constant 0 : index
      %175 = vector.load %arg10[%c3_112, %c0_113, %c0_114] : memref<4x16x32xf32, #tpu.memory_space<vmem>>, vector<1x16x32xf32>
      %176 = vector.shape_cast %175 : vector<1x16x32xf32> to vector<16x32xf32>
      %c3_115 = arith.constant 3 : index
      %c0_116 = arith.constant 0 : index
      %c0_117 = arith.constant 0 : index
      %177 = vector.load %arg9[%c3_115, %c0_116, %c0_117] : memref<4x16x1xf32, #tpu.memory_space<vmem>>, vector<1x16x1xf32>
      %178 = vector.shape_cast %177 : vector<1x16x1xf32> to vector<16x1xf32>
      %179 = vector.broadcast %178 : vector<16x1xf32> to vector<16x32xf32>
      %180 = arith.divf %176, %179 : vector<16x32xf32>
      %181 = tpu.concatenate %162, %168, %174, %180 in 1 : vector<16x32xf32>, vector<16x32xf32>, vector<16x32xf32>, vector<16x32xf32> -> vector<16x128xf32>
      %c0_118 = arith.constant 0 : index
      %c0_119 = arith.constant 0 : index
      %c0_120 = arith.constant 0 : index
      %182 = vector.load %arg6[%c0_118, %c0_119, %c0_120] : memref<1x16x128xf32, #tpu.memory_space<vmem>>, vector<1x16x128xf32>
      %183 = vector.shape_cast %182 : vector<1x16x128xf32> to vector<16x128xf32>
      %184 = vector.shape_cast %181 : vector<16x128xf32> to vector<1x16x128xf32>
      tpu.vector_store %arg6[%c0_118, %c0_119, %c0_120], %184 {strides = array<i32>} : memref<1x16x128xf32, #tpu.memory_space<vmem>>, vector<1x16x128xf32>,
    } else {
    }
    return
  }
  func.func @transform_0(%arg0: i32, %arg1: i32, %arg2: i32) -> (i32, i32, i32) {
    %c0_i32 = arith.constant 0 : i32
    %c0_i32_0 = arith.constant 0 : i32
    return %arg0, %arg1, %c0_i32 : i32, i32, i32
  }
  func.func @transform_1(%arg0: i32, %arg1: i32, %arg2: i32) -> (i32, i32, i32) {
    %c0_i32 = arith.constant 0 : i32
    %c0_i32_0 = arith.constant 0 : i32
    return %arg0, %arg2, %c0_i32 : i32, i32, i32
  }
  func.func @transform_2(%arg0: i32, %arg1: i32, %arg2: i32) -> (i32, i32, i32) {
    %c0_i32 = arith.constant 0 : i32
    %c0_i32_0 = arith.constant 0 : i32
    return %arg0, %arg2, %c0_i32 : i32, i32, i32
  }
  func.func @transform_3(%arg0: i32, %arg1: i32, %arg2: i32) -> (i32, i32, i32) {
    %c0_i32 = arith.constant 0 : i32
    %c0_i32_0 = arith.constant 0 : i32
    return %arg0, %arg1, %c0_i32 : i32, i32, i32
  }
}

</mosaic_0001>

<bundles_post_ra>
// kernel: tpu_custom_call.1
= control target key start
LH: loop header
LB: loop body
LE: loop exit
PB: predicated region body
PF: predicated region fallthrough
CT: control target
= control target key end

     0   :  { %s2291_s0 = inlined_call_operand.hbm [shape: f32[2,16,128], index: 0, kind: input, shape index: {}]   ;;  %s2292_s1 = inlined_call_operand.hbm [shape: f32[2,16,128], index: 1, kind: input, shape index: {}]   ;;  %s2293_s2 = inlined_call_operand.hbm [shape: f32[2,16,128], index: 2, kind: input, shape index: {}]   ;;  %s2294_s3 = inlined_call_operand.hbm [shape: f32[2,16,128], index: 3, kind: output, shape index: {}]  }
   0x1   :  { %2304 = sst [smem:[#allocation19_spill]] %s2292_s1 }
   0x2   :  { %8 = vsyncpa [#allocation7], 0 }
   0x3   :  { %10 = vsyncpa [#allocation7 + $0x1], 0 }
   0x4   :  { %11 = vsyncpa [#allocation10], 0 }
   0x5   :  { %13 = vsyncpa [#allocation10 + $0x1], 0 }
   0x6   :  { %14 = vsyncpa [#allocation8], 0 }
   0x7   :  { %16 = vsyncpa [#allocation8 + $0x1], 0  ;;  %s1724_s12 = smov 0   ;;  %s1726_s13 = smov 0  }
   0x8   :  { %s1728_s14 = smov 0   ;;  %s1730_s15 = smov 0  }
   0x9   :  { %s1732_s16 = smov 0   ;;  %s1734_s17 = smov 0  }
   0xa LB: > { %2305 = sst [smem:[#allocation16_spill]] %s1683_s16  ;;  %s1755_s18 = sadd.s32 4294967295, %s1687_s17   ;;  %s1687_s17 = sphi %s1734_s17, %s22_s17   ;;  %s1683_s16 = sphi %s1732_s16, %s2328_s16   ;;  %s1679_s15 = sphi %s1730_s15, %s2327_s15   ;;  %s1675_s14 = sphi %s1728_s14, %s2331_s14   ;;  %s1671_s13 = sphi %s1726_s13, %s2330_s13   ;;  %s1667_s12 = sphi %s1724_s12, %s2329_s12  }
   0xb   : > { %s1280_s19 = sadd.s32 4294967294, %s1687_s17   ;;  %s41_s20 = sadd.s32 1, %s1683_s16 }
   0xc   : > { %s50_s21 = sadd.s32 1, %s1675_s14  ;;  %p43_p0 = scmp.ge.s32.totalorder %s41_s20, 2 }
   0xd   : > { %p57_p1 = scmp.ne.s32.totalorder %s1675_s14, %s1671_s13  ;;  %p58_p2 = scmp.eq.s32.totalorder %s1687_s17, 0 }
   0xe   : > { %p63_p3 = scmp.ne.s32.totalorder %s1671_s13, %s1667_s12  ;;  %s2333_s20 = smov (%p43_p0, %s41_s20), 0 }
   0xf   : > { %2306 = sst [smem:[#allocation17_spill]] %s2333_s20  ;;  %p1767_p4 = por %p58_p2, %p57_p1 }
  0x10   : > { %p64_p5 = scmp.eq.s32.totalorder %s1755_s18, 0  ;;  %s45_s23 = ssub.s32 %s1683_s16, %s2333_s20 }
  0x11   : > { %p145_p6 = scmp.eq.s32.totalorder %s1755_s18, 1  ;;  %p48_p7 = scmp.eq.s32.totalorder %s45_s23, 0 }
  0x12   : > { %p1775_p8 = por %p64_p5, %p63_p3  ;;  %p151_p10 = scmp.eq.s32.totalorder %s1280_s19, 1 }
  0x13   : > { %p1779_p9 = por %p145_p6, %p57_p1  ;;  %p1400_p13 = scmp.lt.s32.totalorder %s1687_s17, 2 }
  0x14   : > { %s2308_s24 = scalar_select %p1775_p8, 1, 0 }
  0x15   : > { %s2309_s25 = scalar_select %p1779_p9, 1, 0 }
  0x16   : > { %s1784_s26 = scalar_select %p48_p7, %s1675_s14, %s50_s21  }
  0x17   : > { %p1786_p11 = por %p151_p10, %p63_p3  ;;  %s2297_s28 = sand.u32 1, %s1675_s14  }
  0x18   : > { %2310 = sst [smem:[#allocation18_spill]] %s1784_s26  ;;  %s1795_s29 = sshll.u32 %s2297_s28, 4 }
  0x19   : > { %s2311_s27 = scalar_select %p1786_p11, 1, 0 }
  0x1a   : > { %s1798_s30 = sshll.u32 %s1683_s16, 8  ;;  %p1802_p0 = pnand %p1400_p13, %p1767_p4 }
  0x1b   : > { %s194_s5 = sand.u32 1, %s1687_s17   ;;  %s2313_s1 = sld [smem:[#allocation19_spill]] }
  0x1c   : > { %s198_s9 = scalar_lea.vmem [#allocation9], %s1795_s29  ;;  %s1818_s11 = scalar_lea.sflag [#allocation10], %s194_s5 }
  0x1d   : > { %s207_s10 = sshll.u32 %s198_s9, 4  ;;  %p1824_p4 = pneg %p1802_p0  ;;  %s1815_s10 = int_to_ptr.vmem [resolvable:$true] %s207_s10 }
  0x21   : > { %s1811_s8 = scalar_lea.hbm %s2313_s1, %s1798_s30  ;;  %s1516_s6 = scalar_lea.hbm %s2313_s1, 512 }
  0x22   : > { %s1511_s19 = scalar_lea.hbm %s1811_s8, 256  ;;  %p1517_p7 = scmp.lt.u32.totalorder %s1811_s8, %s2313_s1 }
  0x23   : > { %p1512_p3 = scmp.ne.s32.totalorder %s1811_s8, %s1511_s19  ;;  %p1518_p10 = scmp.lt.u32.totalorder %s1516_s6, %s1511_s19 }
  0x24   : > { %p1520_p12 = scmp.lt.u32.totalorder %s1511_s19, %s1811_s8 }
  0x25   : > { %p1514_p5 = pnand %p1824_p4, %p1512_p3  ;;  %p1519_p13 = por %p1518_p10, %p1517_p7 }
  0x27   : > { %p1515_p6 = pneg %p1514_p5  ;;  %p1521_p1 = por %p1520_p12, %p1519_p13 }
  0x29   : > { %p1522_p2 = pnand %p1521_p1, %p1515_p6 }
  0x2b   : > { %1525 = shalt.err (!%p1522_p2)
}
  0x2c   : > { %s1526_s5 = scalar_lea.vmem %s1815_s10, 256  ;;  %s1689_s22 = smov [#allocation9]  }
  0x2d   : > { %p1527_p3 = scmp.ne.s32.totalorder %s1815_s10, %s1526_s5  ;;  %s1531_s23 = sshll.u32 %s1689_s22, 4  ;;  %s1532_s23 = int_to_ptr.vmem [resolvable:$false] %s1531_s23 }
  0x2e   : > { %s1533_s7 = scalar_lea.vmem %s1532_s23, 512  ;;  %p1534_p9 = scmp.lt.s32.totalorder %s1815_s10, %s1532_s23 }
  0x2f   : > { %p1529_p5 = pnand %p1527_p3, %p1824_p4  ;;  %p1535_p8 = scmp.lt.s32.totalorder %s1533_s7, %s1526_s5 }
  0x31   : > { %p1530_p11 = pneg %p1529_p5  ;;  %p1536_p7 = por %p1535_p8, %p1534_p9 }
  0x33   : > { %p1537_p10 = pnand %p1536_p7, %p1530_p11 }
  0x35   : > { %1540 = shalt.err (!%p1537_p10)
}
  0x36   : > { %s2298_s19 = smov 128   ;;  %s2300_s6 = smov 8  }
  0x37   : > { %1392 = dma.hbm_to_vmem [thread:$0]  (!%p1802_p0), %s1811_s8, 256, %s1815_s10, %s1818_s11, %s2298_s19, %s2298_s19, %s2300_s6  }
  0x38   : > { %p2315_p8 = scmp.lt.s32.totalorder %s1687_s17, 3  ;;  %p2316_p9 = scmp.ge.s32.totalorder %s1687_s17, 1 }
  0x39   : > { %s1863_s23 = scalar_lea.hbm %s2291_s0, %s1798_s30  ;;  %s175_s7 = scalar_lea.vmem [#allocation6], %s1795_s29 }
  0x3a   : > { %p1855_p11 = pnand %p2316_p9, %p2315_p8  ;;  %s184_s28 = sshll.u32 %s175_s7, 4  ;;  %s1866_s28 = int_to_ptr.vmem [resolvable:$true] %s184_s28 }
  0x3b   : > { %s1872_s19 = scalar_lea.hbm %s2293_s2, %s1798_s30  ;;  %s2318_s6 = sand.u32 1, %s1675_s14  }
  0x3c   : > { %s2317_s9 = scalar_select %p1855_p11, 1, 0 }
  0x3d   : > { %s1876_s1 = scalar_lea.sflag [#allocation7], %s2318_s6  ;;  %s1541_s20 = scalar_lea.hbm %s1863_s23, 256 }
  0x3e   : > { %p1542_p12 = scmp.ne.s32.totalorder %s1863_s23, %s1541_s20  ;;  %s1546_s16 = scalar_lea.hbm %s2291_s0, 512 }
  0x3f   : > { %p1547_p6 = scmp.lt.u32.totalorder %s1863_s23, %s2291_s0  ;;  %p1548_p13 = scmp.lt.u32.totalorder %s1546_s16, %s1541_s20 }
  0x40   : > { %p1544_p1 = pnand %p1542_p12, %p1824_p4  ;;  %p1550_p5 = scmp.lt.u32.totalorder %s1541_s20, %s1863_s23 }
  0x41   : > { %p1549_p3 = por %p1548_p13, %p1547_p6 }
  0x42   : > { %p1545_p2 = pneg %p1544_p1 }
  0x43   : > { %p1551_p7 = por %p1550_p5, %p1549_p3 }
  0x45   : > { %p1552_p10 = pnand %p1551_p7, %p1545_p2 }
  0x47   : > { %1555 = shalt.err (!%p1552_p10)
}
  0x48   : > { %s1556_s30 = scalar_lea.vmem %s1866_s28, 256  ;;  %s1692_s6 = smov [#allocation6]  }
  0x49   : > { %p1557_p8 = scmp.ne.s32.totalorder %s1866_s28, %s1556_s30  ;;  %s1561_s8 = sshll.u32 %s1692_s6, 4  ;;  %s1562_s8 = int_to_ptr.vmem [resolvable:$false] %s1561_s8 }
  0x4a   : > { %s1563_s26 = scalar_lea.vmem %s1562_s8, 512  ;;  %p1564_p1 = scmp.lt.s32.totalorder %s1866_s28, %s1562_s8 }
  0x4b   : > { %p1559_p9 = pnand %p1557_p8, %p1824_p4  ;;  %p1565_p11 = scmp.lt.s32.totalorder %s1563_s26, %s1556_s30 }
  0x4d   : > { %p1560_p12 = pneg %p1559_p9  ;;  %p1566_p6 = por %p1565_p11, %p1564_p1 }
  0x4f   : > { %p1567_p13 = pnand %p1566_p6, %p1560_p12 }
  0x51   : > { %1570 = shalt.err (!%p1567_p13)
}
  0x52   : > { %s2319_s16 = smov 8   ;;  %s2320_s20 = smov 128  }
  0x53   : > { %1389 = dma.hbm_to_vmem [thread:$0]  (!%p1802_p0), %s1863_s23, 256, %s1866_s28, %s1876_s1, %s2320_s20, %s2320_s20, %s2319_s16  }
  0x54   : > { %s221_s10 = scalar_lea.vmem [#allocation11], %s1795_s29  ;;  %s1571_s22 = scalar_lea.hbm %s1872_s19, 256 }
  0x55   : > { %s230_s5 = sshll.u32 %s221_s10, 4  ;;  %p1572_p11 = scmp.ne.s32.totalorder %s1872_s19, %s1571_s22  ;;  %s1904_s5 = int_to_ptr.vmem [resolvable:$true] %s230_s5 }
  0x56   : > { %s1576_s6 = scalar_lea.hbm %s2293_s2, 512  ;;  %p1577_p5 = scmp.lt.u32.totalorder %s1872_s19, %s2293_s2 }
  0x57   : > { %p1574_p2 = pnand %p1572_p11, %p1824_p4  ;;  %p1578_p7 = scmp.lt.u32.totalorder %s1576_s6, %s1571_s22 }
  0x58   : > { %p1580_p8 = scmp.lt.u32.totalorder %s1571_s22, %s1872_s19 }
  0x59   : > { %p1575_p3 = pneg %p1574_p2  ;;  %p1579_p10 = por %p1578_p7, %p1577_p5 }
  0x5b   : > { %p1581_p9 = por %p1580_p8, %p1579_p10 }
  0x5d   : > { %p1582_p12 = pnand %p1581_p9, %p1575_p3 }
  0x5f   : > { %1585 = shalt.err (!%p1582_p12)
}
  0x60   : > { %s1586_s1 = scalar_lea.vmem %s1904_s5, 256  ;;  %s1693_s28 = smov [#allocation11]  }
  0x61   : > { %p1587_p1 = scmp.ne.s32.totalorder %s1904_s5, %s1586_s1  ;;  %s1591_s29 = sshll.u32 %s1693_s28, 4  ;;  %s1592_s29 = int_to_ptr.vmem [resolvable:$false] %s1591_s29 }
  0x62   : > { %s1593_s23 = scalar_lea.vmem %s1592_s29, 512  ;;  %p1594_p11 = scmp.lt.s32.totalorder %s1904_s5, %s1592_s29 }
  0x63   : > { %p1589_p6 = pnand %p1587_p1, %p1824_p4  ;;  %p1595_p2 = scmp.lt.s32.totalorder %s1593_s23, %s1586_s1 }
  0x65   : > { %p1590_p13 = pneg %p1589_p6  ;;  %p1596_p5 = por %p1595_p2, %p1594_p11 }
  0x67   : > { %p1597_p7 = pnand %p1596_p5, %p1590_p13 }
  0x69   : > { %1600 = shalt.err (!%p1597_p7)
}
  0x6a   : > { %1395 = dma.hbm_to_vmem [thread:$0]  (!%p1802_p0), %s1872_s19, 256, %s1904_s5, %s1818_s11, %s2320_s20, %s2320_s20, %s2319_s16  }
  0x6b   : > { %p2321_p4 = scmp.ne.s32.totalorder %s2317_s9, 0 }
  0x6c   : > { %s1934_s21 = sand.u32 (!%p2321_p4), 1, %s1671_s13   ;;  %p2322_p3 = scmp.ne.s32.totalorder (!%p2321_p4), %s2308_s24, 0 }
  0x6d   : > { %242 = sbr.rel (%p2321_p4) target bundleno = 1590 (0x636), region = 32  ;;  %s1937_s10 = sshll.u32 (!%p2321_p4), %s1934_s21, 4 }
  0x6e   : > { %s245_s4 = scalar_lea.sflag (!%p2321_p4), [#allocation7], %s1934_s21  ;;  %s248_s22 = scalar_lea.vmem (!%p2321_p4), [#allocation6], %s1937_s10 }
  0x74   : > { %1654 = dma.done.wait (%p2322_p3), %s245_s4, 256  }
  0x75   : > { %1656 = vsyncadd (%p2322_p3), %s245_s4, 4294967040  ;;  %s253_s11 = sand.u32 1, %s1755_s18   ;;  %s257_s9 = scalar_lea.vmem [#allocation9], %s1937_s10 }
  0x76   : > { %s254_s19 = scalar_lea.sflag [#allocation10], %s253_s11 }
  0x77   : > { %1658 = dma.done.wait (%p2322_p3), %s254_s19, 512  }
  0x78   : > { %1660 = vsyncadd (%p2322_p3), %s254_s19, 4294966784  ;;  %vm325_vm0 = vcmask 261120   ;;  %v1694_v0 = vmov 0.0   ;;  %vm1695_vm1 = vmmov 0   ;;  %v341_v1 = vld [vmem:[%s257_s9] sm:$0xff]  ;;  %v342_v2 = vld [vmem:[%s257_s9 + $0x8] sm:$0xff] }
  0x79   : > { %1330 = vmatprep.subr.bf16.mxu0 %v1694_v0  ;;  %326 = vst.msk [vmem:[#allocation5] sm:$0xff] %vm325_vm0, %v1694_v0  ;;  %327 = vst.msk [vmem:[#allocation5 + $0x8] sm:$0xff] %vm325_vm0, %v1694_v0  ;;  %1332 = vmatprep.mubr.msk.bf16.mxu0 %vm1695_vm1, %v1694_v0  ;;  %v334_v3 = vld [vmem:[%s248_s22] sm:$0xff]  ;;  %v1973_v4 = vpack.c.bf16 %v342_v2, %v341_v1  ;;  %v335_v5 = vld [vmem:[%s248_s22 + $0x8] sm:$0xff]  ;;  %vm308_vm2 = vcmask 7168   ;;  %v1696_v10 = vmov -inf  }
  0x7a   : > { %328 = vst.msk [vmem:[#allocation5 + $0x10] sm:$0xff] %vm325_vm0, %v1694_v0  ;;  %329 = vst.msk [vmem:[#allocation5 + $0x18] sm:$0xff] %vm325_vm0, %v1694_v0  ;;  %1336 = vmatprep.subr.bf16.mxu1 %v1694_v0  ;;  %1338 = vmatprep.mubr.msk.bf16.mxu1 %vm1695_vm1, %v1694_v0  ;;  %v336_v7 = vmul.f32 0.17677669, %v334_v3  ;;  %v337_v8 = vmul.f32 0.17677669, %v335_v5 }
  0x7b   : > { %330 = vst.msk [vmem:[#allocation5 + $0x20] sm:$0xff] %vm325_vm0, %v1694_v0  ;;  %331 = vst.msk [vmem:[#allocation5 + $0x28] sm:$0xff] %vm325_vm0, %v1694_v0  ;;  %v352_v6 = vsel %vm325_vm0, %v1973_v4, 0  ;;  %vm397_vm3 = vcmask 130048   ;;  %v1697_v17 = vmov 0   ;;  %s1698_s18 = smov 96  }
  0x7c   : > { %332 = vst.msk [vmem:[#allocation5 + $0x30] sm:$0xff] %vm325_vm0, %v1694_v0  ;;  %333 = vst.msk [vmem:[#allocation5 + $0x38] sm:$0xff] %vm325_vm0, %v1694_v0  ;;  %1331 = vmatpush3.bf16.xpose.msra.mxu0 %v352_v6  ;;  %v338_v9 = vpack.c.bf16 %v337_v8, %v336_v7  ;;  %1461 = vset.pattern.permute.xlu1 %v1697_v17  ;;  %s266_s24 = scalar_lea.vmem [#allocation11], %s1937_s10  ;;  %s1699_s16 = smov 64   ;;  %vm1116_vm4 = vcmask 523264   ;;  %vm1119_vm5 = vcmask 785408  }
  0x7d   : > { %1348 = vmatprep.subr.bf16.mxu0 %v1694_v0  ;;  %309 = vst.msk [vmem:[#allocation3] sm:$0xff] %vm308_vm2, %v1696_v10  ;;  %310 = vst.msk [vmem:[#allocation3 + $0x8] sm:$0xff] %vm308_vm2, %v1696_v10  ;;  %1462 = vset.pattern.permute.xlu0 %v1697_v17  ;;  %v344_v26 = vld [vmem:[%s266_s24] sm:$0xff]  ;;  %v345_v27 = vld [vmem:[%s266_s24 + $0x8] sm:$0xff]  ;;  %s1700_s20 = smov 32   ;;  %s298_s5 = scalar_lea.vmem [#allocation12], %s1937_s10 }
  0x7e   : > { %311 = vst.msk [vmem:[#allocation3 + $0x10] sm:$0xff] %vm308_vm2, %v1696_v10  ;;  %312 = vst.msk [vmem:[#allocation3 + $0x18] sm:$0xff] %vm308_vm2, %v1696_v10  ;;  %v2031_v28 = vpack.c.bf16 %v345_v27, %v344_v26  ;;  %s1140_s7 = sshll.u32 %s298_s5, 4  ;;  %s1313_s30 = sshll.u32 %s1679_s15, 8  ;;  %s2234_s7 = int_to_ptr.vmem [resolvable:$true] %s1140_s7 }
  0x7f   : > { %313 = vst.msk [vmem:[#allocation3 + $0x20] sm:$0xff] %vm308_vm2, %v1696_v10  ;;  %314 = vst.msk [vmem:[#allocation3 + $0x28] sm:$0xff] %vm308_vm2, %v1696_v10  ;;  %s2240_s26 = scalar_lea.hbm %s2294_s3, %s1313_s30  ;;  %s1125_s15 = scalar_lea.sflag [#allocation8], %s1934_s21 }
  0x80   : > { %315 = vst.msk [vmem:[#allocation3 + $0x30] sm:$0xff] %vm308_vm2, %v1696_v10  ;;  %316 = vst.msk [vmem:[#allocation3 + $0x38] sm:$0xff] %vm308_vm2, %v1696_v10  ;;  %1337 = vmatpush3.bf16.msra.mxu1 %v2031_v28  ;;  %s1601_s1 = scalar_lea.vmem %s2234_s7, 256  ;;  %p2323_p10 = scmp.ne.s32.totalorder %s2309_s25, 0 }
  0x81   : > { %317 = vst.msk [vmem:[#allocation4] sm:$0xff] %vm308_vm2, %v1694_v0  ;;  %318 = vst.msk [vmem:[#allocation4 + $0x8] sm:$0xff] %vm308_vm2, %v1694_v0  ;;  %1342 = vmatprep.subr.bf16.mxu1 %v1694_v0  ;;  %p1602_p0 = scmp.ne.s32.totalorder %s2234_s7, %s1601_s1  ;;  %s1701_s28 = smov [#allocation12]  }
  0x82   : > { %319 = vst.msk [vmem:[#allocation4 + $0x10] sm:$0xff] %vm308_vm2, %v1694_v0  ;;  %320 = vst.msk [vmem:[#allocation4 + $0x18] sm:$0xff] %vm308_vm2, %v1694_v0  ;;  %s1605_s29 = sshll.u32 %s1701_s28, 4  ;;  %s1606_s29 = int_to_ptr.vmem [resolvable:$false] %s1605_s29 }
  0x83   : > { %1333 = vmatmul.mubr.msk.bf16.vlgmr.msra.gmra.mrb[0].mxu0 %vm325_vm0, %v338_v9  ;;  %321 = vst.msk [vmem:[#allocation4 + $0x20] sm:$0xff] %vm308_vm2, %v1694_v0  ;;  %322 = vst.msk [vmem:[#allocation4 + $0x28] sm:$0xff] %vm308_vm2, %v1694_v0  ;;  %p1603_p8 = pnand %p1602_p0, %p2323_p10  ;;  %s1607_s23 = scalar_lea.vmem %s1606_s29, 512 }
  0x84   : > { %1350 = vmatprep.mubr.msk.bf16.mxu0 %vm1695_vm1, %v1694_v0  ;;  %323 = vst.msk [vmem:[#allocation4 + $0x30] sm:$0xff] %vm308_vm2, %v1694_v0  ;;  %324 = vst.msk [vmem:[#allocation4 + $0x38] sm:$0xff] %vm308_vm2, %v1694_v0  ;;  %v2009_v18 = vld [vmem:[#allocation3] sm:$0xff]  ;;  %v2014_v21 = vld [vmem:[#allocation3 + $0x8] sm:$0xff]  ;;  %p1608_p12 = scmp.lt.s32.totalorder %s2234_s7, %s1606_s29  ;;  %p1609_p1 = scmp.lt.s32.totalorder %s1607_s23, %s1601_s1 }
  0x85   : > { %v2090_v6 = vld [vmem:[#allocation3 + $0x10] sm:$0xff]  ;;  %v2092_v8 = vld [vmem:[#allocation3 + $0x18] sm:$0xff]  ;;  %p1604_p9 = pneg %p1603_p8 }
  0x86   : > { %p1610_p6 = por %p1609_p1, %p1608_p12 }
  0x88   : > { %p1611_p13 = pnand %p1610_p6, %p1604_p9 }
 0x156   : > { %v388_v11 = vpop.f32.mrb[0].mxu0 }
 0x157   : > { %v1334_v12 = vpop.f32.mrb[1].mxu0  ;;  %v398_v13 = vsel %vm397_vm3, %v388_v11, -inf }
 0x158   : > { %399 = vmax.xlane.f32.xlu0 %v398_v13  ;;  %v391_v14 = vpop.f32.mrb[2].mxu0 }
 0x159   : > { %v1335_v15 = vpop.f32.mrb[3].mxu0  ;;  %v401_v16 = vsel %vm397_vm3, %v391_v14, -inf }
 0x15c   : > { %402 = vmax.xlane.f32.xlu0 %v401_v16  ;;  %v2114_v16 = vld [vmem:[#allocation3 + $0x28] sm:$0xff] }
 0x172   : > { %512 = vrot.lane.b32.xlu0 %v1973_v4, %s1698_s18 }
 0x1e5   : > { %v400_v19 = vpop.xlane.xlu0 %399 }
 0x1e6   : > { %v2012_v20 = vmax.f32 %v2009_v18, %v400_v19 }
 0x1e8   : > { %v406_v22 = vsub.f32 %v2009_v18, %v2012_v20  ;;  %506 = vst.msk [vmem:[#allocation3] sm:$0xff] %vm308_vm2, %v2012_v20  ;;  %414 = vperm.xlu1 %1461, %v2012_v20  }
 0x1e9   : > { %v403_v23 = vpop.xlane.xlu0 %402 }
 0x1ea   : > { %v2022_v24 = vmax.f32 %v2014_v21, %v403_v23 }
 0x1ec   : > { %v407_v25 = vsub.f32 %v2014_v21, %v2022_v24  ;;  %507 = vst.msk [vmem:[#allocation3 + $0x8] sm:$0xff] %vm308_vm2, %v2022_v24  ;;  %419 = vperm.xlu1 %1461, %v2022_v24  }
 0x1ed   : > { %v513_v36 = vpop.permute.xlu0 %512 }
 0x1ee   : > { %v518_v39 = vsel %vm325_vm0, %v513_v36, 0  ;;  %v410_v20 = vmul.f32 1.442695, %v407_v25 }
 0x1f0   : > { %509 = vrot.lane.b32.xlu1 %v338_v9, %s1698_s18 }
 0x1f4   : > { %681 = vrot.lane.b32.xlu1 %v1973_v4, %s1699_s16 }
 0x1f8   : > { %679 = vrot.lane.b32.xlu1 %v338_v9, %s1699_s16 }
 0x1fc   : > { %849 = vrot.lane.b32.xlu1 %v1973_v4, %s1700_s20 }
 0x200   : > { %847 = vrot.lane.b32.xlu1 %v338_v9, %s1700_s20 }
 0x267   : > { %v415_v29 = vpop.permute.xlu1 %414 }
 0x268   : > { %v422_v30 = vsub.f32 %v388_v11, %v415_v29  ;;  %v2131_v29 = vld [vmem:[#allocation3 + $0x30] sm:$0xff] }
 0x26a   : > { %v424_v31 = vmul.f32 1.442695, %v422_v30 }
 0x26b   : > { %v420_v32 = vpop.permute.xlu1 %419 }
 0x26c   : > { %v423_v33 = vsub.f32 %v391_v14, %v420_v32  ;;  %1463 = vpow2.f32 %v424_v31  ;;  %v2110_v14 = vld [vmem:[#allocation3 + $0x20] sm:$0xff]  ;;  %v2134_v31 = vld [vmem:[#allocation3 + $0x38] sm:$0xff] }
 0x26e   : > { %v426_v34 = vmul.f32 1.442695, %v423_v33 }
 0x26f   : > { %v510_v35 = vpop.permute.xlu1 %509 }
 0x270   : > { %1465 = vpow2.f32 %v426_v34 }
 0x273   : > { %v682_v41 = vpop.permute.xlu1 %681 }
 0x274   : > { %v687_v43 = vsel %vm325_vm0, %v682_v41, 0 }
 0x276   : > { %v2041_v37 = vpop.eup %1463 }
 0x277   : > { %v680_v42 = vpop.permute.xlu1 %679 }
 0x27a   : > { %v2043_v38 = vpop.eup %1465 }
 0x27b   : > { %v457_v40 = vpack.c.bf16 %v2043_v38, %v2041_v37  ;;  %v850_v44 = vpop.permute.xlu1 %849 }
 0x27c   : > { %v855_v45 = vsel %vm325_vm0, %v850_v44, 0 }
 0x27d   : > { %1339 = vmatmul.mubr.msk.bf16.vlgmr.msra.gmra.mrb[0].mxu1 %vm397_vm3, %v457_v40  ;;  %v432_v40 = vsel %vm397_vm3, %v2041_v37, 0.0 }
 0x27e   : > { %1343 = vmatpush3.bf16.xpose.msra.mxu1 %v518_v39  ;;  %1344 = vmatprep.mubr.msk.bf16.mxu1 %vm1695_vm1, %v1694_v0  ;;  %v435_v39 = vsel %vm397_vm3, %v2043_v38, 0.0 }
 0x27f   : > { %1354 = vmatprep.subr.bf16.mxu1 %v1694_v0  ;;  %v848_v46 = vpop.permute.xlu1 %847 }
 0x285   : > { %1345 = vmatmul.mubr.msk.bf16.vlgmr.msra.gmra.mrb[4].mxu1 %vm325_vm0, %v510_v35 }
 0x286   : > { %1355 = vmatpush3.bf16.xpose.msra.mxu1 %v687_v43  ;;  %1356 = vmatprep.mubr.msk.bf16.mxu1 %vm1695_vm1, %v1694_v0 }
 0x287   : > { %1366 = vmatprep.subr.bf16.mxu1 %v1694_v0 }
 0x28d   : > { %1357 = vmatmul.mubr.msk.bf16.vlgmr.msra.gmra.mrb[8].mxu1 %vm325_vm0, %v680_v42 }
 0x28e   : > { %1367 = vmatpush3.bf16.xpose.msra.mxu1 %v855_v45  ;;  %1368 = vmatprep.mubr.msk.bf16.mxu1 %vm1695_vm1, %v1694_v0 }
 0x295   : > { %1369 = vmatmul.mubr.msk.bf16.vlgmr.msra.gmra.mrb[12].mxu1 %vm325_vm0, %v848_v46 }
 0x350   : > { %v2062_v47 = vpop.f32.mrb[0].mxu1 }
 0x351   : > { %v1340_v48 = vpop.f32.mrb[1].mxu1 }
 0x352   : > { %v2064_v49 = vpop.f32.mrb[2].mxu1 }
 0x353   : > { %v1341_v50 = vpop.f32.mrb[3].mxu1 }
 0x358   : > { %v2066_v51 = vpop.f32.mrb[4].mxu1 }
 0x359   : > { %v1346_v52 = vpop.f32.mrb[5].mxu1  ;;  %v564_v53 = vsel %vm397_vm3, %v2066_v51, -inf }
 0x35a   : > { %565 = vmax.xlane.f32.xlu1 %v564_v53  ;;  %v2070_v54 = vpop.f32.mrb[6].mxu1 }
 0x35b   : > { %v1347_v55 = vpop.f32.mrb[7].mxu1  ;;  %v567_v56 = vsel %vm397_vm3, %v2070_v54, -inf }
 0x35c   : > { %568 = vmax.xlane.f32.xlu0 %v567_v56 }
 0x360   : > { %v2074_v57 = vpop.f32.mrb[8].mxu1 }
 0x361   : > { %v1358_v58 = vpop.f32.mrb[9].mxu1  ;;  %v733_v59 = vsel %vm397_vm3, %v2074_v57, -inf }
 0x362   : > { %734 = vmax.xlane.f32.xlu0 %v733_v59  ;;  %v2078_v60 = vpop.f32.mrb[10].mxu1 }
 0x363   : > { %v1359_v61 = vpop.f32.mrb[11].mxu1  ;;  %v736_v62 = vsel %vm397_vm3, %v2078_v60, -inf }
 0x364   : > { %737 = vmax.xlane.f32.xlu1 %v736_v62 }
 0x368   : > { %v2082_v63 = vpop.f32.mrb[12].mxu1 }
 0x369   : > { %v1370_v1 = vpop.f32.mrb[13].mxu1  ;;  %v901_v2 = vsel %vm397_vm3, %v2082_v63, -inf }
 0x36a   : > { %902 = vmax.xlane.f32.xlu0 %v901_v2  ;;  %v2086_v3 = vpop.f32.mrb[14].mxu1 }
 0x36b   : > { %v1371_v4 = vpop.f32.mrb[15].mxu1  ;;  %v904_v5 = vsel %vm397_vm3, %v2086_v3, -inf }
 0x36c   : > { %905 = vmax.xlane.f32.xlu1 %v904_v5 }
 0x3e7   : > { %v566_v7 = vpop.xlane.xlu1 %565 }
 0x3e8   : > { %v2095_v9 = vmax.f32 %v2090_v6, %v566_v7 }
 0x3e9   : > { %v569_v10 = vpop.xlane.xlu0 %568 }
 0x3ea   : > { %v572_v11 = vsub.f32 %v2090_v6, %v2095_v9  ;;  %677 = vst.msk [vmem:[#allocation3 + $0x10] sm:$0xff] %vm308_vm2, %v2095_v9  ;;  %v2102_v12 = vmax.f32 %v2092_v8, %v569_v10  ;;  %580 = vperm.xlu0 %1462, %v2095_v9  }
 0x3ec   : > { %v573_v13 = vsub.f32 %v2092_v8, %v2102_v12  ;;  %678 = vst.msk [vmem:[#allocation3 + $0x18] sm:$0xff] %vm308_vm2, %v2102_v12  ;;  %585 = vperm.xlu1 %1461, %v2102_v12  }
 0x3ee   : > { %962 = vrot.lane.b32.xlu0 %v2031_v28, %s1700_s20 }
 0x3ef   : > { %v735_v15 = vpop.xlane.xlu0 %734 }
 0x3f0   : > { %v2117_v17 = vmax.f32 %v2110_v14, %v735_v15  ;;  %v574_v15 = vmul.f32 1.442695, %v572_v11 }
 0x3f1   : > { %v738_v19 = vpop.xlane.xlu1 %737 }
 0x3f2   : > { %v741_v23 = vsub.f32 %v2110_v14, %v2117_v17  ;;  %845 = vst.msk [vmem:[#allocation3 + $0x20] sm:$0xff] %vm308_vm2, %v2117_v17  ;;  %v2124_v26 = vmax.f32 %v2114_v16, %v738_v19  ;;  %749 = vperm.xlu1 %1461, %v2117_v17   ;;  %v576_v14 = vmul.f32 1.442695, %v573_v13 }
 0x3f4   : > { %v742_v27 = vsub.f32 %v2114_v16, %v2124_v26  ;;  %846 = vst.msk [vmem:[#allocation3 + $0x28] sm:$0xff] %vm308_vm2, %v2124_v26  ;;  %v743_v19 = vmul.f32 1.442695, %v741_v23  ;;  %v429_v16 = vld [vmem:[#allocation4 + $0x8] sm:$0xff] }
 0x3f6   : > { %754 = vperm.xlu1 %1461, %v2124_v26   ;;  %v745_v21 = vmul.f32 1.442695, %v742_v27 }
 0x3f7   : > { %v903_v30 = vpop.xlane.xlu0 %902 }
 0x3f8   : > { %v2137_v32 = vmax.f32 %v2131_v29, %v903_v30 }
 0x3f9   : > { %v906_v33 = vpop.xlane.xlu1 %905 }
 0x3fa   : > { %v909_v34 = vsub.f32 %v2131_v29, %v2137_v32  ;;  %1013 = vst.msk [vmem:[#allocation3 + $0x30] sm:$0xff] %vm308_vm2, %v2137_v32  ;;  %v2144_v35 = vmax.f32 %v2134_v31, %v906_v33  ;;  %917 = vperm.xlu1 %1461, %v2137_v32  }
 0x3fc   : > { %v910_v36 = vsub.f32 %v2134_v31, %v2144_v35  ;;  %1014 = vst.msk [vmem:[#allocation3 + $0x38] sm:$0xff] %vm308_vm2, %v2144_v35  ;;  %v911_v25 = vmul.f32 1.442695, %v909_v34  ;;  %v428_v31 = vld [vmem:[#allocation4] sm:$0xff] }
 0x3fe   : > { %922 = vperm.xlu1 %1461, %v2144_v35  }
 0x402   : > { %626 = vrot.lane.b32.xlu1 %v2031_v28, %s1698_s18 }
 0x406   : > { %794 = vrot.lane.b32.xlu1 %v2031_v28, %s1699_s16 }
 0x40d   : > { %436 = vadd.xlane.f32.xlu0 %v435_v39  ;;  %v595_v39 = vld [vmem:[#allocation4 + $0x10] sm:$0xff] }
 0x42a   : > { %433 = vadd.xlane.f32.xlu1 %v432_v40  ;;  %v596_v40 = vld [vmem:[#allocation4 + $0x18] sm:$0xff] }
 0x469   : > { %v581_v41 = vpop.permute.xlu0 %580 }
 0x46a   : > { %v588_v42 = vsub.f32 %v2066_v51, %v581_v41 }
 0x46b   : > { %v586_v43 = vpop.permute.xlu1 %585 }
 0x46c   : > { %v590_v44 = vmul.f32 1.442695, %v588_v42  ;;  %v589_v45 = vsub.f32 %v2070_v54, %v586_v43 }
 0x46d   : > { %v963_v6 = vpop.permute.xlu0 %962 }
 0x46e   : > { %1467 = vpow2.f32 %v590_v44  ;;  %v592_v46 = vmul.f32 1.442695, %v589_v45 }
 0x470   : > { %1469 = vpow2.f32 %v592_v46 }
 0x471   : > { %v750_v48 = vpop.permute.xlu1 %749 }
 0x472   : > { %v757_v28 = vsub.f32 %v2074_v57, %v750_v48  ;;  %v764_v48 = vld [vmem:[#allocation4 + $0x20] sm:$0xff] }
 0x474   : > { %v759_v50 = vmul.f32 1.442695, %v757_v28 }
 0x475   : > { %v755_v38 = vpop.permute.xlu1 %754 }
 0x476   : > { %1471 = vpow2.f32 %v759_v50  ;;  %v758_v52 = vsub.f32 %v2078_v60, %v755_v38  ;;  %v443_v38 = vld [vmem:[#allocation5] sm:$0xff] }
 0x478   : > { %v1468_v37 = vpop.eup %1467  ;;  %v761_v53 = vmul.f32 1.442695, %v758_v52  ;;  %v765_v52 = vld [vmem:[#allocation4 + $0x28] sm:$0xff] }
 0x479   : > { %v918_v55 = vpop.permute.xlu1 %917  ;;  %v599_v51 = vsel %vm397_vm3, %v1468_v37, 0.0 }
 0x47a   : > { %v1470_v56 = vpop.eup %1469  ;;  %1473 = vpow2.f32 %v761_v53  ;;  %v925_v54 = vsub.f32 %v2082_v63, %v918_v55  ;;  %600 = vadd.xlane.f32.xlu1 %v599_v51  ;;  %v408_v63 = vmul.f32 1.442695, %v406_v22 }
 0x47b   : > { %v602_v58 = vsel %vm397_vm3, %v1470_v56, 0.0  ;;  %v624_v59 = vpack.c.bf16 %v1470_v56, %v1468_v37 }
 0x47c   : > { %v927_v61 = vmul.f32 1.442695, %v925_v54  ;;  %603 = vadd.xlane.f32.xlu0 %v602_v58 }
 0x47d   : > { %v923_v57 = vpop.permute.xlu1 %922 }
 0x47e   : > { %1475 = vpow2.f32 %v927_v61  ;;  %v926_v62 = vsub.f32 %v2086_v3, %v923_v57 }
 0x480   : > { %v1472_v60 = vpop.eup %1471  ;;  %v929_v1 = vmul.f32 1.442695, %v926_v62 }
 0x481   : > { %v627_v2 = vpop.permute.xlu1 %626  ;;  %v768_v4 = vsel %vm397_vm3, %v1472_v60, 0.0 }
 0x482   : > { %1477 = vpow2.f32 %v929_v1  ;;  %769 = vadd.xlane.f32.xlu1 %v768_v4  ;;  %1349 = vmatpush3.bf16.msra.mxu0 %v627_v2  ;;  %v933_v1 = vld [vmem:[#allocation4 + $0x38] sm:$0xff] }
 0x483   : > { %1360 = vmatprep.subr.bf16.mxu0 %v1694_v0  ;;  %1479 = vpow2.f32 %v408_v63 }
 0x484   : > { %v1474_v5 = vpop.eup %1473  ;;  %1481 = vpow2.f32 %v574_v15 }
 0x485   : > { %1351 = vmatmul.mubr.msk.bf16.vlgmr.msra.gmra.mrb[4].mxu0 %vm397_vm3, %v624_v59  ;;  %v771_v7 = vsel %vm397_vm3, %v1474_v5, 0.0  ;;  %v795_v3 = vpop.permute.xlu1 %794  ;;  %v793_v10 = vpack.c.bf16 %v1474_v5, %v1472_v60  ;;  %1483 = vpow2.f32 %v410_v20  ;;  %v932_v59 = vld [vmem:[#allocation4 + $0x30] sm:$0xff] }
 0x486   : > { %772 = vadd.xlane.f32.xlu1 %v771_v7  ;;  %1361 = vmatpush3.bf16.msra.mxu0 %v795_v3  ;;  %1485 = vpow2.f32 %v743_v19 }
 0x487   : > { %1362 = vmatprep.mubr.msk.bf16.mxu0 %vm1695_vm1, %v1694_v0  ;;  %1372 = vmatprep.subr.bf16.mxu0 %v1694_v0  ;;  %1487 = vpow2.f32 %v745_v21  ;;  %v611_v21 = vld [vmem:[#allocation5 + $0x18] sm:$0xff] }
 0x488   : > { %v1476_v18 = vpop.eup %1475  ;;  %1489 = vpow2.f32 %v911_v25 }
 0x489   : > { %v936_v22 = vsel %vm397_vm3, %v1476_v18, 0.0  ;;  %1491 = vpow2.f32 %v576_v14 }
 0x48a   : > { %937 = vadd.xlane.f32.xlu1 %v936_v22 }
 0x48c   : > { %v1478_v9 = vpop.eup %1477 }
 0x48d   : > { %1363 = vmatmul.mubr.msk.bf16.vlgmr.msra.gmra.mrb[8].mxu0 %vm397_vm3, %v793_v10  ;;  %v939_v11 = vsel %vm397_vm3, %v1478_v9, 0.0  ;;  %v961_v30 = vpack.c.bf16 %v1478_v9, %v1476_v18  ;;  %v1480_v24 = vpop.eup %1479  ;;  %v444_v10 = vld [vmem:[#allocation5 + $0x8] sm:$0xff] }
 0x48e   : > { %940 = vadd.xlane.f32.xlu1 %v939_v11  ;;  %1373 = vmatpush3.bf16.msra.mxu0 %v963_v6  ;;  %v1482_v17 = vpop.eup %1481  ;;  %v430_v34 = vmul.f32 %v1480_v24, %v428_v31  ;;  %v610_v11 = vld [vmem:[#allocation5 + $0x10] sm:$0xff] }
 0x48f   : > { %1374 = vmatprep.mubr.msk.bf16.mxu0 %vm1695_vm1, %v1694_v0  ;;  %v1484_v23 = vpop.eup %1483  ;;  %v913_v0 = vmul.f32 1.442695, %v910_v36  ;;  %v597_v41 = vmul.f32 %v1482_v17, %v595_v39 }
 0x490   : > { %v1486_v26 = vpop.eup %1485  ;;  %v431_v27 = vmul.f32 %v1484_v23, %v429_v16 }
 0x491   : > { %1493 = vpow2.f32 %v913_v0  ;;  %v1488_v8 = vpop.eup %1487  ;;  %v766_v28 = vmul.f32 %v1486_v26, %v764_v48 }
 0x492   : > { %447 = vperm.xlu0 %1462, %v1480_v24   ;;  %v1490_v12 = vpop.eup %1489  ;;  %v767_v56 = vmul.f32 %v1488_v8, %v765_v52 }
 0x493   : > { %v1492_v13 = vpop.eup %1491  ;;  %v934_v62 = vmul.f32 %v1490_v12, %v932_v59 }
 0x494   : > { %v598_v44 = vmul.f32 %v1492_v13, %v596_v40  ;;  %v947_v40 = vld [vmem:[#allocation5 + $0x30] sm:$0xff] }
 0x495   : > { %1375 = vmatmul.mubr.msk.bf16.vlgmr.msra.gmra.mrb[12].mxu0 %vm397_vm3, %v961_v30 }
 0x496   : > { %614 = vperm.xlu0 %1462, %v1482_v17  }
 0x49a   : > { %v437_v29 = vpop.xlane.xlu0 %436  ;;  %783 = vperm.xlu0 %1462, %v1486_v26  }
 0x49b   : > { %v439_v32 = vadd.f32 %v437_v29, %v431_v27  ;;  %v1494_v33 = vpop.eup %1493  ;;  %v779_v29 = vld [vmem:[#allocation5 + $0x20] sm:$0xff] }
 0x49c   : > { %v935_v63 = vmul.f32 %v1494_v33, %v933_v1 }
 0x49d   : > { %442 = vst.msk [vmem:[#allocation4 + $0x8] sm:$0xff] %vm308_vm2, %v439_v32  ;;  %v780_v32 = vld [vmem:[#allocation5 + $0x28] sm:$0xff] }
 0x49e   : > { %788 = vperm.xlu0 %1462, %v1488_v8  }
 0x49f   : > { %452 = vperm.xlu1 %1461, %v1484_v23  }
 0x4a2   : > { %951 = vperm.xlu0 %1462, %v1490_v12  }
 0x4a3   : > { %619 = vperm.xlu1 %1461, %v1492_v13  }
 0x4a4   : > { %v1021_v6 = vld [vmem:[#allocation4 + $0x8] sm:$0xff] }
 0x4a6   : > { %956 = vperm.xlu0 %1462, %v1494_v33  }
 0x4b7   : > { %v434_v35 = vpop.xlane.xlu1 %433 }
 0x4b8   : > { %v438_v36 = vadd.f32 %v434_v35, %v430_v34 }
 0x4ba   : > { %441 = vst.msk [vmem:[#allocation4] sm:$0xff] %vm308_vm2, %v438_v36 }
 0x4c1   : > { %v1020_v19 = vld [vmem:[#allocation4] sm:$0xff] }
 0x507   : > { %v601_v42 = vpop.xlane.xlu1 %600 }
 0x508   : > { %v605_v43 = vadd.f32 %v601_v42, %v597_v41  ;;  %v948_v41 = vld [vmem:[#allocation5 + $0x38] sm:$0xff] }
 0x509   : > { %v604_v45 = vpop.xlane.xlu0 %603 }
 0x50a   : > { %607 = vst.msk [vmem:[#allocation4 + $0x10] sm:$0xff] %vm308_vm2, %v605_v43  ;;  %v606_v46 = vadd.f32 %v604_v45, %v598_v44 }
 0x50c   : > { %608 = vst.msk [vmem:[#allocation4 + $0x18] sm:$0xff] %vm308_vm2, %v606_v46 }
 0x50f   : > { %v770_v50 = vpop.xlane.xlu1 %769 }
 0x510   : > { %v774_v37 = vadd.f32 %v770_v50, %v766_v28 }
 0x511   : > { %v448_v53 = vpop.permute.xlu0 %447  ;;  %v1038_v55 = vld [vmem:[#allocation4 + $0x10] sm:$0xff] }
 0x512   : > { %776 = vst.msk [vmem:[#allocation4 + $0x20] sm:$0xff] %vm308_vm2, %v774_v37  ;;  %v455_v51 = vmul.f32 %v448_v53, %v443_v38  ;;  %1042 = vperm.xlu1 %1461, %v1038_v55  }
 0x513   : > { %v773_v54 = vpop.xlane.xlu1 %772  ;;  %v1039_v58 = vld [vmem:[#allocation4 + $0x18] sm:$0xff] }
 0x514   : > { %v502_v61 = vadd.f32 %v2062_v47, %v455_v51  ;;  %v775_v57 = vadd.f32 %v773_v54, %v767_v56  ;;  %1047 = vperm.xlu0 %1462, %v1039_v58  }
 0x515   : > { %v615_v9 = vpop.permute.xlu0 %614 }
 0x516   : > { %504 = vst.msk [vmem:[#allocation5] sm:$0xff] %vm325_vm0, %v502_v61  ;;  %v622_v25 = vmul.f32 %v615_v9, %v610_v11 }
 0x517   : > { %777 = vst.msk [vmem:[#allocation4 + $0x28] sm:$0xff] %vm308_vm2, %v775_v57  ;;  %v938_v60 = vpop.xlane.xlu1 %937 }
 0x518   : > { %v942_v2 = vadd.f32 %v938_v60, %v934_v62 }
 0x519   : > { %v1056_v4 = vld [vmem:[#allocation4 + $0x20] sm:$0xff]  ;;  %v784_v30 = vpop.permute.xlu0 %783 }
 0x51a   : > { %944 = vst.msk [vmem:[#allocation4 + $0x30] sm:$0xff] %vm308_vm2, %v942_v2  ;;  %1060 = vperm.xlu1 %1461, %v1056_v4   ;;  %v791_v8 = vmul.f32 %v784_v30, %v779_v29 }
 0x51b   : > { %v941_v5 = vpop.xlane.xlu1 %940 }
 0x51c   : > { %v943_v7 = vadd.f32 %v941_v5, %v935_v63 }
 0x51d   : > { %v1018_v9 = vld [vmem:[#allocation5] sm:$0xff] }
 0x51e   : > { %v1057_v3 = vld [vmem:[#allocation4 + $0x28] sm:$0xff]  ;;  %945 = vst.msk [vmem:[#allocation4 + $0x38] sm:$0xff] %vm308_vm2, %v943_v7 }
 0x51f   : > { %1065 = vperm.xlu0 %1462, %v1057_v3   ;;  %v453_v47 = vpop.permute.xlu1 %452 }
 0x520   : > { %v456_v15 = vmul.f32 %v453_v47, %v444_v10 }
 0x521   : > { %v1074_v18 = vld [vmem:[#allocation4 + $0x30] sm:$0xff] }
 0x522   : > { %v503_v20 = vadd.f32 %v2064_v49, %v456_v15  ;;  %1078 = vperm.xlu1 %1461, %v1074_v18   ;;  %v789_v49 = vpop.permute.xlu0 %788 }
 0x523   : > { %v620_v24 = vpop.permute.xlu1 %619  ;;  %v792_v33 = vmul.f32 %v789_v49, %v780_v32 }
 0x524   : > { %505 = vst.msk [vmem:[#allocation5 + $0x8] sm:$0xff] %vm325_vm0, %v503_v20  ;;  %v623_v17 = vmul.f32 %v620_v24, %v611_v21 }
 0x525   : > { %v1075_v22 = vld [vmem:[#allocation4 + $0x38] sm:$0xff] }
 0x526   : > { %1083 = vperm.xlu0 %1462, %v1075_v22   ;;  %1024 = vperm.xlu1 %1461, %v1020_v19   ;;  %v952_v12 = vpop.permute.xlu0 %951 }
 0x527   : > { %v959_v43 = vmul.f32 %v952_v12, %v947_v40 }
 0x52a   : > { %1029 = vperm.xlu0 %1462, %v1021_v6   ;;  %v957_v42 = vpop.permute.xlu0 %956 }
 0x52b   : > { %v960_v45 = vmul.f32 %v957_v42, %v948_v41 }
 0x558   : > { %v666_v14 = vpop.f32.mrb[4].mxu0 }
 0x559   : > { %v673_v23 = vadd.f32 %v666_v14, %v622_v25  ;;  %v1352_v16 = vpop.f32.mrb[5].mxu0  ;;  %v1019_v14 = vld [vmem:[#allocation5 + $0x8] sm:$0xff] }
 0x55a   : > { %v669_v0 = vpop.f32.mrb[6].mxu0 }
 0x55b   : > { %675 = vst.msk [vmem:[#allocation5 + $0x10] sm:$0xff] %vm325_vm0, %v673_v23  ;;  %v674_v26 = vadd.f32 %v669_v0, %v623_v17  ;;  %v1353_v27 = vpop.f32.mrb[7].mxu0 }
 0x55d   : > { %676 = vst.msk [vmem:[#allocation5 + $0x18] sm:$0xff] %vm325_vm0, %v674_v26 }
 0x560   : > { %v834_v13 = vpop.f32.mrb[8].mxu0 }
 0x561   : > { %v841_v31 = vadd.f32 %v834_v13, %v791_v8  ;;  %v1364_v34 = vpop.f32.mrb[9].mxu0 }
 0x562   : > { %v837_v35 = vpop.f32.mrb[10].mxu0  ;;  %v1036_v51 = vld [vmem:[#allocation5 + $0x10] sm:$0xff] }
 0x563   : > { %843 = vst.msk [vmem:[#allocation5 + $0x20] sm:$0xff] %vm325_vm0, %v841_v31  ;;  %v842_v36 = vadd.f32 %v837_v35, %v792_v33  ;;  %v1365_v39 = vpop.f32.mrb[11].mxu0 }
 0x564   : > { %v1037_v59 = vld [vmem:[#allocation5 + $0x18] sm:$0xff] }
 0x565   : > { %844 = vst.msk [vmem:[#allocation5 + $0x28] sm:$0xff] %vm325_vm0, %v842_v36 }
 0x568   : > { %v1002_v44 = vpop.f32.mrb[12].mxu0 }
 0x569   : > { %v1009_v46 = vadd.f32 %v1002_v44, %v959_v43  ;;  %v1376_v48 = vpop.f32.mrb[13].mxu0 }
 0x56a   : > { %v1005_v28 = vpop.f32.mrb[14].mxu0  ;;  %v1054_v60 = vld [vmem:[#allocation5 + $0x20] sm:$0xff] }
 0x56b   : > { %1011 = vst.msk [vmem:[#allocation5 + $0x30] sm:$0xff] %vm325_vm0, %v1009_v46  ;;  %v1010_v50 = vadd.f32 %v1005_v28, %v960_v45  ;;  %v1377_v38 = vpop.f32.mrb[15].mxu0 }
 0x56c   : > { %v1055_v63 = vld [vmem:[#allocation5 + $0x28] sm:$0xff] }
 0x56d   : > { %1012 = vst.msk [vmem:[#allocation5 + $0x38] sm:$0xff] %vm325_vm0, %v1010_v50 }
 0x572   : > { %v1072_v3 = vld [vmem:[#allocation5 + $0x30] sm:$0xff] }
 0x574   : > { %v1073_v15 = vld [vmem:[#allocation5 + $0x38] sm:$0xff] }
 0x591   : > { %v1043_v52 = vpop.permute.xlu1 %1042 }
 0x592   : > { %1495 = vrcp.f32 %v1043_v52 }
 0x593   : > { %v1048_v37 = vpop.permute.xlu0 %1047 }
 0x594   : > { %1497 = vrcp.f32 %v1048_v37 }
 0x599   : > { %v1061_v53 = vpop.permute.xlu1 %1060 }
 0x59a   : > { %1499 = vrcp.f32 %v1061_v53 }
 0x59c   : > { %v1496_v55 = vpop.eup %1495 }
 0x59d   : > { %v1051_v54 = vmul.f32 %v1496_v55, %v1036_v51 }
 0x59e   : > { %v1066_v56 = vpop.permute.xlu0 %1065  ;;  %v1498_v58 = vpop.eup %1497 }
 0x59f   : > { %1501 = vrcp.f32 %v1066_v56  ;;  %1092 = vrot.lane.b32.xlu1 %v1051_v54, %s1700_s20  ;;  %v1053_v61 = vmul.f32 %v1498_v58, %v1037_v59 }
 0x5a1   : > { %v1079_v57 = vpop.permute.xlu1 %1078  ;;  %1094 = vrot.lane.b32.xlu0 %v1053_v61, %s1700_s20 }
 0x5a2   : > { %1503 = vrcp.f32 %v1079_v57 }
 0x5a4   : > { %v1500_v62 = vpop.eup %1499 }
 0x5a5   : > { %v1084_v1 = vpop.permute.xlu0 %1083  ;;  %v1069_v2 = vmul.f32 %v1500_v62, %v1054_v60  ;;  %v1025_v20 = vpop.permute.xlu1 %1024 }
 0x5a6   : > { %1505 = vrcp.f32 %v1084_v1 }
 0x5a7   : > { %1100 = vrot.lane.b32.xlu1 %v1069_v2, %s1699_s16  ;;  %1507 = vrcp.f32 %v1025_v20 }
 0x5a9   : > { %v1502_v4 = vpop.eup %1501  ;;  %v1030_v22 = vpop.permute.xlu0 %1029 }
 0x5aa   : > { %v1071_v5 = vmul.f32 %v1502_v4, %v1055_v63  ;;  %1509 = vrcp.f32 %v1030_v22 }
 0x5ac   : > { %1102 = vrot.lane.b32.xlu0 %v1071_v5, %s1699_s16  ;;  %v1504_v7 = vpop.eup %1503 }
 0x5ad   : > { %v1087_v10 = vmul.f32 %v1504_v7, %v1072_v3 }
 0x5af   : > { %1108 = vrot.lane.b32.xlu1 %v1087_v10, %s1698_s18 }
 0x5b0   : > { %v1506_v47 = vpop.eup %1505 }
 0x5b1   : > { %v1089_v18 = vmul.f32 %v1506_v47, %v1073_v15  ;;  %v1508_v6 = vpop.eup %1507 }
 0x5b2   : > { %v1033_v21 = vmul.f32 %v1508_v6, %v1018_v9 }
 0x5b3   : > { %1110 = vrot.lane.b32.xlu0 %v1089_v18, %s1698_s18 }
 0x5b4   : > { %v1510_v24 = vpop.eup %1509 }
 0x5b5   : > { %v1035_v49 = vmul.f32 %v1510_v24, %v1019_v14 }
 0x611   : > { %v1093_v19 = vpop.permute.xlu1 %1092 }
 0x612   : > { %v1114_v25 = vsel %vm325_vm0, %v1033_v21, %v1093_v19 }
 0x613   : > { %v1095_v11 = vpop.permute.xlu0 %1094 }
 0x614   : > { %v1115_v26 = vsel %vm325_vm0, %v1035_v49, %v1095_v11 }
 0x619   : > { %v1101_v30 = vpop.permute.xlu1 %1100 }
 0x61a   : > { %v1117_v17 = vsel %vm1116_vm4, %v1114_v25, %v1101_v30 }
 0x61e   : > { %v1103_v23 = vpop.permute.xlu0 %1102 }
 0x61f   : > { %v1118_v27 = vsel %vm1116_vm4, %v1115_v26, %v1103_v23 }
 0x621   : > { %v1109_v16 = vpop.permute.xlu1 %1108 }
 0x622   : > { %v1120_v0 = vsel %vm1119_vm5, %v1117_v17, %v1109_v16 }
 0x623   : > { %1122 = vst [vmem:[%s298_s5] sm:$0xff] %v1120_v0 }
 0x625   : > { %v1111_v29 = vpop.permute.xlu0 %1110 }
 0x626   : > { %v1121_v32 = vsel %vm1119_vm5, %v1118_v27, %v1111_v29 }
 0x627   : > { %1123 = vst [vmem:[%s298_s5 + $0x8] sm:$0xff] %v1121_v32 }
 0x628   : > { %1614 = shalt.err (!%p1611_p13)
}
 0x629   : > { %s1615_s10 = scalar_lea.hbm %s2240_s26, 256  ;;  %s1619_s11 = scalar_lea.hbm %s2294_s3, 512 }
 0x62a   : > { %p1616_p11 = scmp.ne.s32.totalorder %s2240_s26, %s1615_s10  ;;  %p1620_p7 = scmp.lt.u32.totalorder %s2240_s26, %s2294_s3 }
 0x62b   : > { %p1621_p4 = scmp.lt.u32.totalorder %s1619_s11, %s1615_s10  ;;  %p1623_p0 = scmp.lt.u32.totalorder %s1615_s10, %s2240_s26 }
 0x62c   : > { %p1617_p2 = pnand %p1616_p11, %p2323_p10 }
 0x62d   : > { %p1622_p3 = por %p1621_p4, %p1620_p7 }
 0x62e   : > { %p1618_p5 = pneg %p1617_p2 }
 0x62f   : > { %p1624_p8 = por %p1623_p0, %p1622_p3 }
 0x631   : > { %p1625_p9 = pnand %p1624_p8, %p1618_p5 }
 0x633   : > { %1628 = shalt.err (!%p1625_p9)
}
 0x634   : > { %s1702_s18 = smov 128   ;;  %s1703_s24 = smov 8  }
 0x635   : > { %1384 = dma.vmem_to_hbm [thread:$0]  (%p2323_p10), %s2234_s7, 256, %s2240_s26, %s1125_s15, %s1702_s18, %s1702_s18, %s1703_s24  }
 0x636 PF: > { %s1155_s16 = sand.u32 1, %s1667_s12   ;;  %p2324_p12 = scmp.ne.s32.totalorder %s2311_s27, 0 }
 0x637   : > { %p2325_p1 = scmp.ge.s32.totalorder %s1687_s17, 2  ;;  %s1156_s20 = scalar_lea.sflag [#allocation8], %s1155_s16 }
 0x639   : > { %p1397_p6 = pnand %p2325_p1, %p2324_p12 }
 0x63b   : > { %1662 = dma.done.wait (!%p1397_p6), %s1156_s20, 256  }
 0x63c   : > { %1664 = vsyncadd (!%p1397_p6), %s1156_s20, 4294967040  ;;  %s22_s17 = sadd.s32 1, %s1687_s17   ;;  %s2326_s5 = sld [smem:[#allocation18_spill]] }
 0x63d   : > { %p19_p13 = scmp.ge.s32.totalorder %s22_s17, 4   ;;  %s2327_s15 = sld [smem:[#allocation16_spill]] }
 0x63e   : > { %s2328_s16 = sld [smem:[#allocation17_spill]]  ;;  %s2329_s12 = smov %s1671_s13 }
 0x63f   : > { %s2330_s13 = smov %s1675_s14  ;;  %21 = sbr.rel (!%p19_p13) target bundleno = 10 (0xa), region = 118 }
 0x642   : > { %s2331_s14 = smov %s2326_s5 }
 0x646   :  { %1161 = vsyncpa [#allocation7], 1 }
 0x647   :  { %1163 = vsyncpa [#allocation7 + $0x1], 1 }
 0x648   :  { %1164 = vsyncpa [#allocation10], 1 }
 0x649   :  { %1166 = vsyncpa [#allocation10 + $0x1], 1 }
 0x64a   :  { %1167 = vsyncpa [#allocation8], 1 }
 0x64b   :  { %1169 = vsyncpa [#allocation8 + $0x1], 1 }

</bundles_post_ra>
